<compile_context>
chip_gen: v5e
topology: v5e:2x2
jax: 0.10.0
libtpu: 0.0.40
codegen_flags: <defaults>
</compile_context>

<pallas_src>
import jax
import jax.numpy as jnp
from jax.experimental import pallas as pl
from jax.experimental.pallas import tpu as pltpu


def _round_up(x, m):
    return (x + m - 1) // m * m


def _pad_dim(d, multiple=16):
    """Pad feature dim to a bf16-sublane-friendly multiple."""
    return max(multiple, _round_up(d, multiple))


# ---------------------------------------------------------------------------
# Pallas kernel: full MLP in batch-on-lanes layout.
#   x_ref : (D_pad, T)  bf16   (batch on the 128-lane axis; contiguous slab)
#   w_i   : (H_i, H_{i-1}) bf16 (PyTorch (out, in) layout -> h = W @ x)
#   b_i   : (H_i, 1)   f32
#   wo    : (H_last,1) f32     (final Linear(prev->1) done as VPU mul + reduce)
#   bo    : (1, 1)     f32
#   o_ref : (1, T)     f32     (lane-dense output row -> unmasked vst)
# ---------------------------------------------------------------------------
def dmr_mlp_kernel(x_ref, *refs):
    *wb_refs, wo_ref, bo_ref, o_ref = refs
    n_hidden = len(wb_refs) // 2

    h = x_ref[...]                                              # (D_pad, T) bf16
    for i in range(n_hidden):
        w = wb_refs[2 * i][...]                                 # (H_i, H_{i-1}) bf16
        b = wb_refs[2 * i + 1][...]                             # (H_i, 1) f32
        h = jnp.dot(w, h, preferred_element_type=jnp.float32)   # MXU, f32 accumulate
        h = jnp.maximum(h + b, 0.0)                             # VPU in f32 (v5e-safe)
        if i + 1 < n_hidden:
            h = h.astype(jnp.bfloat16)                          # feed next MXU in bf16

    # Final Linear(prev -> 1): elementwise multiply + sublane reduce (VPU/XLU);
    # avoids a K=64, N=1 MXU round trip for ~0 useful flops.
    logit = jnp.sum(wo_ref[...] * h, axis=0, keepdims=True) + bo_ref[...]   # (1, T)
    o_ref[...] = jax.nn.sigmoid(logit)                          # lane-dense store


# ---------------------------------------------------------------------------
# pallas_call wrapper: takes pre-assembled batch-on-lanes slabs.
# ---------------------------------------------------------------------------
def dmr_mlp_pallas(x_slabs, hidden_params, wo, bo):
    """x_slabs: (num_tiles, D_pad, T) bf16. hidden_params: list of (w(out,in), b(out,))."""
    num_tiles, d_pad, t = x_slabs.shape
    assert t % 128 == 0, "batch tile must be a multiple of 128 lanes"

    # Weights stay in PyTorch (out, in) layout -> h = W @ x.  Layer 1 gets zero
    # columns for the padded feature dims (contributes exactly 0 to the dot).
    ws, bs = [], []
    for li, (w, b) in enumerate(hidden_params):
        if li == 0:
            d_in = w.shape[1]
            if d_in != d_pad:
                w = jnp.zeros((w.shape[0], d_pad), w.dtype).at[:, :d_in].set(w)
        ws.append(w.astype(jnp.bfloat16))
        bs.append(b.reshape(-1, 1).astype(jnp.float32))
    wo_col = wo.reshape(-1, 1).astype(jnp.float32)              # (H_last, 1)
    bo_sc = bo.reshape(1, 1).astype(jnp.float32)                # (1, 1)

    def resident(arr):  # weights/biases: same (tiny) block every grid step
        return pl.BlockSpec(arr.shape, lambda i: (0,) * arr.ndim)

    # Contiguous slab per grid step (leading axis squeezed away in the kernel).
    in_specs = [pl.BlockSpec((None, d_pad, t), lambda i: (i, 0, 0))]
    flat_args = [x_slabs]
    for w, b in zip(ws, bs):
        in_specs += [resident(w), resident(b)]
        flat_args += [w, b]
    in_specs += [resident(wo_col), resident(bo_sc)]
    flat_args += [wo_col, bo_sc]

    # Rough per-step VMEM budget; only raise the scoped limit when it would
    # exceed the smallest default (v5e's 16 MiB), keeping defaults elsewhere.
    hidden_dims = [w.shape[0] for w, _ in hidden_params]
    est = 2 * d_pad * t * 2                                      # 2x bf16 input slab
    est += sum(h * t * (4 + 2) for h in hidden_dims)             # f32 act + bf16 copy
    est += 2 * t * 4                                             # 2x f32 output row
    est += 2 * sum(w.size * 2 + b.shape[0] * 128 * 4 for w, b in zip(ws, bs))
    vmem_limit = None
    if est > (12 << 20):
        vmem_limit = min(int(est * 1.5), 96 << 20)

    out = pl.pallas_call(
        dmr_mlp_kernel,
        out_shape=jax.ShapeDtypeStruct((1, num_tiles * t), jnp.float32),
        grid_spec=pltpu.PrefetchScalarGridSpec(
            num_scalar_prefetch=0,
            grid=(num_tiles,),
            in_specs=in_specs,
            out_specs=pl.BlockSpec((1, t), lambda i: (0, i)),
        ),
        compiler_params=pltpu.CompilerParams(
            dimension_semantics=("parallel",),
            vmem_limit_bytes=vmem_limit),
    )(*flat_args)
    return out[0]                                                # (num_tiles * T,)


# ---------------------------------------------------------------------------
# Feature assembly directly into batch-on-lanes slabs (no (B, D) f32 concat).
# ---------------------------------------------------------------------------
def assemble_features_slabs(dense_vals, sparse_ids, embedding_tables, *,
                            d_pad, batch_tile):
    """Returns (num_tiles, d_pad, batch_tile) bf16; zero-padded on the feature
    axis (to d_pad) and on the batch axis (to a multiple of batch_tile)."""
    ref = dense_vals[0] if dense_vals else sparse_ids[0]
    b = ref.shape[0]
    b_pad = _round_up(b, batch_tile)
    num_tiles = b_pad // batch_tile

    def tiled(v):                                   # (B,) -> (num_tiles, T)
        v = jnp.pad(v, (0, b_pad - b))
        return v.reshape(num_tiles, batch_tile)

    parts = []
    for v in dense_vals:
        parts.append(tiled(v.astype(jnp.float32))[:, None, :])   # (nt, 1, T)
    for ids, table in zip(sparse_ids, embedding_tables):
        ids2 = tiled(ids.astype(jnp.int32))                      # (nt, T)
        emb = jnp.take(table, ids2, axis=0)                      # (nt, T, E)
        parts.append(jnp.swapaxes(emb, 1, 2))                    # (nt, E, T)
    x = jnp.concatenate(parts, axis=1)                           # (nt, D, T) f32
    d = x.shape[1]
    if d_pad > d:
        pad = jnp.zeros((num_tiles, d_pad - d, batch_tile), x.dtype)
        x = jnp.concatenate([x, pad], axis=1)
    return x.astype(jnp.bfloat16), b


def dmr_forward(dense_vals, sparse_ids, embedding_tables, hidden, wo, bo,
                *, batch_tile=None):
    """Full DMR forward: slab feature assembly (glue) + fused MLP Pallas kernel."""
    b = (dense_vals[0] if dense_vals else sparse_ids[0]).shape[0]
    d = len(dense_vals) + sum(t.shape[1]
                              for t in embedding_tables[:len(sparse_ids)])
    d_pad = _pad_dim(d)
    if batch_tile is None:
        # Large tiles amortize per-grid-step overhead and give one contiguous
        # input DMA per step; keep >= 2 steps so v7x can use both TensorCores,
        # cap at 4096 samples (~2 KB/sample live set) for VMEM headroom.
        batch_tile = min(4096, max(128, _round_up(pl.cdiv(b, 2), 128)))
    x_slabs, _ = assemble_features_slabs(
        dense_vals, sparse_ids, embedding_tables,
        d_pad=d_pad, batch_tile=batch_tile)
    out = dmr_mlp_pallas(x_slabs, hidden, wo, bo)
    return out[:b]                                               # drop batch padding


# ---------------------------------------------------------------------------
# Plain-JAX glue: parameters and references (references used for testing only)
# ---------------------------------------------------------------------------
def make_params(key, input_dim, hidden_units, memory_hops=1):
    """PyTorch-style Linear init: W (out, in), b (out,), uniform(+-1/sqrt(fan_in))."""
    dims = [input_dim] + list(hidden_units) * max(1, int(memory_hops))
    hidden = []
    for i in range(len(dims) - 1):
        fan_in, fan_out = dims[i], dims[i + 1]
        key, kw, kb = jax.random.split(key, 3)
        bound = 1.0 / jnp.sqrt(float(fan_in))
        w = jax.random.uniform(kw, (fan_out, fan_in), jnp.float32, -bound, bound)
        b = jax.random.uniform(kb, (fan_out,), jnp.float32, -bound, bound)
        hidden.append((w, b))
    fan_in = dims[-1]
    key, kw, kb = jax.random.split(key, 3)
    bound = 1.0 / jnp.sqrt(float(fan_in))
    wo = jax.random.uniform(kw, (fan_in,), jnp.float32, -bound, bound)
    bo = jax.random.uniform(kb, (1,), jnp.float32, -bound, bound)
    return hidden, wo, bo


def assemble_features(dense_vals, sparse_ids, embedding_tables):
    """Reference-only (B, D) f32 feature matrix (mirrors the PyTorch concat)."""
    parts = []
    if dense_vals:
        parts.append(jnp.stack([v.astype(jnp.float32) for v in dense_vals], axis=1))
    for ids, table in zip(sparse_ids, embedding_tables):
        parts.append(jnp.take(table, ids, axis=0))
    return jnp.concatenate(parts, axis=1)


def reference_forward_f32(concat, hidden, wo, bo):
    """Original module semantics, all f32 (Dropout is identity at inference)."""
    h = concat
    for w, b in hidden:
        h = jnp.maximum(h @ w.T + b[None, :], 0.0)
    logit = h @ wo[:, None] + bo[None, :]
    return jax.nn.sigmoid(logit)[:, 0]


def reference_forward_mirrored(concat, hidden, wo, bo):
    """Reference mirroring the kernel's bf16/f32 numerics path."""
    B, D = concat.shape
    d_pad = _pad_dim(D)
    h = jnp.zeros((d_pad, B), jnp.bfloat16).at[:D, :].set(concat.T.astype(jnp.bfloat16))
    n = len(hidden)
    for i, (w, b) in enumerate(hidden):
        if i == 0:
            w = jnp.zeros((w.shape[0], d_pad), w.dtype).at[:, :D].set(w)
        h = jnp.maximum(
            jnp.dot(w.astype(jnp.bfloat16), h, preferred_element_type=jnp.float32)
            + b[:, None], 0.0)
        if i + 1 < n:
            h = h.astype(jnp.bfloat16)
    logit = jnp.sum(wo[:, None] * h, axis=0, keepdims=True) + bo.reshape(1, 1)
    return jax.nn.sigmoid(logit)[0]


if __name__ == "__main__":
    # Deterministic small problem:
    #   3 dense features, 2 sparse features (vocab=100, embed_dim=8)
    #   hidden_units = [256, 128, 64] (module default), memory_hops = 1
    #   batch = 1024 -> auto batch_tile = 512 (2 grid steps, lane-dense slabs)
    key = jax.random.PRNGKey(0)
    B = 1024
    n_dense, n_sparse = 3, 2
    vocab, embed_dim = 100, 8
    hidden_units = [256, 128, 64]
    memory_hops = 1
    input_dim = n_dense + n_sparse * embed_dim  # 3 + 16 = 19

    key, *dkeys = jax.random.split(key, n_dense + 1)
    dense_vals = [jax.random.normal(k, (B,), jnp.float32) for k in dkeys]

    key, *skeys = jax.random.split(key, n_sparse + 1)
    sparse_ids = [jax.random.randint(k, (B,), 0, vocab) for k in skeys]

    key, *ekeys = jax.random.split(key, n_sparse + 1)
    embedding_tables = [jax.random.normal(k, (vocab, embed_dim), jnp.float32)
                        for k in ekeys]

    key, pkey = jax.random.split(key)
    hidden, wo, bo = make_params(pkey, input_dim, hidden_units, memory_hops)

    out = dmr_forward(dense_vals, sparse_ids, embedding_tables, hidden, wo, bo)
    jax.block_until_ready(out)

    concat = assemble_features(dense_vals, sparse_ids, embedding_tables)  # (B, 19)
    ref_exact = reference_forward_mirrored(concat, hidden, wo, bo)
    ref_f32 = reference_forward_f32(concat, hidden, wo, bo)

    assert out.shape == (B,)
    # tight check vs. a reference that mirrors the kernel's bf16/f32 path
    assert jnp.allclose(out, ref_exact, atol=1e-3, rtol=1e-3), \
        float(jnp.max(jnp.abs(out - ref_exact)))
    # semantic check vs. the full-f32 module forward (bf16 rounding only)
    assert jnp.allclose(out, ref_f32, atol=2.5e-2, rtol=0.0), \
        float(jnp.max(jnp.abs(out - ref_f32)))

    print("KERNEL_OK")
</pallas_src>

<mosaic_0001>
module attributes {stable_mosaic.version = 11 : i64} {
  func.func @dmr_mlp_kernel(%arg0: i32, %arg1: memref<1x32x512xbf16, #tpu.memory_space<vmem>>, %arg2: memref<256x32xbf16, #tpu.memory_space<vmem>>, %arg3: memref<256x1xf32, #tpu.memory_space<vmem>>, %arg4: memref<128x256xbf16, #tpu.memory_space<vmem>>, %arg5: memref<128x1xf32, #tpu.memory_space<vmem>>, %arg6: memref<64x128xbf16, #tpu.memory_space<vmem>>, %arg7: memref<64x1xf32, #tpu.memory_space<vmem>>, %arg8: memref<64x1xf32, #tpu.memory_space<vmem>>, %arg9: memref<1x1xf32, #tpu.memory_space<vmem>>, %arg10: memref<1x512xf32, #tpu.memory_space<vmem>>) attributes {dimension_semantics = [#tpu.dimension_semantics<parallel>], iteration_bounds = array<i64: 2>, scalar_prefetch = 0 : i64, scratch_operands = 0 : i64, tpu.core_type = #tpu.core_type<tc>, window_params = [{transform_indices = @transform_0, window_bounds = array<i64: 1, 32, 512>}, {pipeline_mode = #tpu.pipeline_mode<synchronous>, transform_indices = @transform_1, window_bounds = array<i64: 256, 32>}, {pipeline_mode = #tpu.pipeline_mode<synchronous>, transform_indices = @transform_2, window_bounds = array<i64: 256, 1>}, {pipeline_mode = #tpu.pipeline_mode<synchronous>, transform_indices = @transform_3, window_bounds = array<i64: 128, 256>}, {pipeline_mode = #tpu.pipeline_mode<synchronous>, transform_indices = @transform_4, window_bounds = array<i64: 128, 1>}, {pipeline_mode = #tpu.pipeline_mode<synchronous>, transform_indices = @transform_5, window_bounds = array<i64: 64, 128>}, {pipeline_mode = #tpu.pipeline_mode<synchronous>, transform_indices = @transform_6, window_bounds = array<i64: 64, 1>}, {pipeline_mode = #tpu.pipeline_mode<synchronous>, transform_indices = @transform_7, window_bounds = array<i64: 64, 1>}, {pipeline_mode = #tpu.pipeline_mode<synchronous>, transform_indices = @transform_8, window_bounds = array<i64: 1, 1>}, {transform_indices = @transform_9, window_bounds = array<i64: 1, 512>}]} {
    %c0 = arith.constant 0 : index
    %c0_0 = arith.constant 0 : index
    %c0_1 = arith.constant 0 : index
    %0 = vector.load %arg1[%c0, %c0_0, %c0_1] : memref<1x32x512xbf16, #tpu.memory_space<vmem>>, vector<1x32x512xbf16>
    %1 = vector.shape_cast %0 : vector<1x32x512xbf16> to vector<32x512xbf16>
    %c0_2 = arith.constant 0 : index
    %c0_3 = arith.constant 0 : index
    %2 = vector.load %arg2[%c0_2, %c0_3] : memref<256x32xbf16, #tpu.memory_space<vmem>>, vector<256x32xbf16>
    %c0_4 = arith.constant 0 : index
    %c0_5 = arith.constant 0 : index
    %3 = vector.load %arg3[%c0_4, %c0_5] : memref<256x1xf32, #tpu.memory_space<vmem>>, vector<256x1xf32>
    %cst = arith.constant dense<0.000000e+00> : vector<256x512xf32>
    %4 = tpu.matmul %2, %1, %cst {dimension_numbers = #tpu.dot_dimension_numbers<[1], [0], [0], [1], [0, 0, 1, 1], [], []>} : vector<256x32xbf16>, vector<32x512xbf16>, vector<256x512xf32> -> vector<256x512xf32>
    %5 = vector.broadcast %3 : vector<256x1xf32> to vector<256x512xf32>
    %6 = arith.addf %4, %5 : vector<256x512xf32>
    %cst_6 = arith.constant 0.000000e+00 : f32
    %7 = vector.broadcast %cst_6 : f32 to vector<256x512xf32>
    %8 = arith.maximumf %6, %7 : vector<256x512xf32>
    %9 = arith.truncf %8 : vector<256x512xf32> to vector<256x512xbf16>
    %c0_7 = arith.constant 0 : index
    %c0_8 = arith.constant 0 : index
    %10 = vector.load %arg4[%c0_7, %c0_8] : memref<128x256xbf16, #tpu.memory_space<vmem>>, vector<128x256xbf16>
    %c0_9 = arith.constant 0 : index
    %c0_10 = arith.constant 0 : index
    %11 = vector.load %arg5[%c0_9, %c0_10] : memref<128x1xf32, #tpu.memory_space<vmem>>, vector<128x1xf32>
    %cst_11 = arith.constant dense<0.000000e+00> : vector<128x512xf32>
    %12 = tpu.matmul %10, %9, %cst_11 {dimension_numbers = #tpu.dot_dimension_numbers<[1], [0], [0], [1], [0, 0, 1, 1], [], []>} : vector<128x256xbf16>, vector<256x512xbf16>, vector<128x512xf32> -> vector<128x512xf32>
    %13 = vector.broadcast %11 : vector<128x1xf32> to vector<128x512xf32>
    %14 = arith.addf %12, %13 : vector<128x512xf32>
    %cst_12 = arith.constant 0.000000e+00 : f32
    %15 = vector.broadcast %cst_12 : f32 to vector<128x512xf32>
    %16 = arith.maximumf %14, %15 : vector<128x512xf32>
    %17 = arith.truncf %16 : vector<128x512xf32> to vector<128x512xbf16>
    %c0_13 = arith.constant 0 : index
    %c0_14 = arith.constant 0 : index
    %18 = vector.load %arg6[%c0_13, %c0_14] : memref<64x128xbf16, #tpu.memory_space<vmem>>, vector<64x128xbf16>
    %c0_15 = arith.constant 0 : index
    %c0_16 = arith.constant 0 : index
    %19 = vector.load %arg7[%c0_15, %c0_16] : memref<64x1xf32, #tpu.memory_space<vmem>>, vector<64x1xf32>
    %cst_17 = arith.constant dense<0.000000e+00> : vector<64x512xf32>
    %20 = tpu.matmul %18, %17, %cst_17 {dimension_numbers = #tpu.dot_dimension_numbers<[1], [0], [0], [1], [0, 0, 1, 1], [], []>} : vector<64x128xbf16>, vector<128x512xbf16>, vector<64x512xf32> -> vector<64x512xf32>
    %21 = vector.broadcast %19 : vector<64x1xf32> to vector<64x512xf32>
    %22 = arith.addf %20, %21 : vector<64x512xf32>
    %cst_18 = arith.constant 0.000000e+00 : f32
    %23 = vector.broadcast %cst_18 : f32 to vector<64x512xf32>
    %24 = arith.maximumf %22, %23 : vector<64x512xf32>
    %c0_19 = arith.constant 0 : index
    %c0_20 = arith.constant 0 : index
    %25 = vector.load %arg8[%c0_19, %c0_20] : memref<64x1xf32, #tpu.memory_space<vmem>>, vector<64x1xf32>
    %26 = vector.broadcast %25 : vector<64x1xf32> to vector<64x512xf32>
    %27 = arith.mulf %26, %24 : vector<64x512xf32>
    %cst_21 = arith.constant dense<0.000000e+00> : vector<512xf32>
    %28 = vector.multi_reduction <add>, %27, %cst_21 [0] : vector<64x512xf32> to vector<512xf32>
    %29 = vector.shape_cast %28 : vector<512xf32> to vector<1x512xf32>
    %c0_22 = arith.constant 0 : index
    %c0_23 = arith.constant 0 : index
    %30 = vector.load %arg9[%c0_22, %c0_23] : memref<1x1xf32, #tpu.memory_space<vmem>>, vector<1x1xf32>
    %31 = vector.broadcast %30 : vector<1x1xf32> to vector<1x512xf32>
    %32 = arith.addf %29, %31 : vector<1x512xf32>
    %33 = arith.negf %32 : vector<1x512xf32>
    %34 = math.exp %33 : vector<1x512xf32>
    %cst_24 = arith.constant 1.000000e+00 : f32
    %35 = vector.broadcast %cst_24 : f32 to vector<1x512xf32>
    %36 = arith.addf %35, %34 : vector<1x512xf32>
    %37 = arith.divf %35, %36 : vector<1x512xf32>
    %c0_25 = arith.constant 0 : index
    %c0_26 = arith.constant 0 : index
    %38 = vector.load %arg10[%c0_25, %c0_26] : memref<1x512xf32, #tpu.memory_space<vmem>>, vector<1x512xf32>
    tpu.vector_store %arg10[%c0_25, %c0_26], %37 {strides = array<i32>} : memref<1x512xf32, #tpu.memory_space<vmem>>, vector<1x512xf32>,
    return
  }
  func.func @transform_0(%arg0: i32) -> (i32, i32, i32) {
    %c0_i32 = arith.constant 0 : i32
    %c0_i32_0 = arith.constant 0 : i32
    %c0_i32_1 = arith.constant 0 : i32
    return %arg0, %c0_i32, %c0_i32_0 : i32, i32, i32
  }
  func.func @transform_1(%arg0: i32) -> (i32, i32) {
    %c0_i32 = arith.constant 0 : i32
    %c0_i32_0 = arith.constant 0 : i32
    %c0_i32_1 = arith.constant 0 : i32
    return %c0_i32, %c0_i32_0 : i32, i32
  }
  func.func @transform_2(%arg0: i32) -> (i32, i32) {
    %c0_i32 = arith.constant 0 : i32
    %c0_i32_0 = arith.constant 0 : i32
    %c0_i32_1 = arith.constant 0 : i32
    return %c0_i32, %c0_i32_0 : i32, i32
  }
  func.func @transform_3(%arg0: i32) -> (i32, i32) {
    %c0_i32 = arith.constant 0 : i32
    %c0_i32_0 = arith.constant 0 : i32
    %c0_i32_1 = arith.constant 0 : i32
    return %c0_i32, %c0_i32_0 : i32, i32
  }
  func.func @transform_4(%arg0: i32) -> (i32, i32) {
    %c0_i32 = arith.constant 0 : i32
    %c0_i32_0 = arith.constant 0 : i32
    %c0_i32_1 = arith.constant 0 : i32
    return %c0_i32, %c0_i32_0 : i32, i32
  }
  func.func @transform_5(%arg0: i32) -> (i32, i32) {
    %c0_i32 = arith.constant 0 : i32
    %c0_i32_0 = arith.constant 0 : i32
    %c0_i32_1 = arith.constant 0 : i32
    return %c0_i32, %c0_i32_0 : i32, i32
  }
  func.func @transform_6(%arg0: i32) -> (i32, i32) {
    %c0_i32 = arith.constant 0 : i32
    %c0_i32_0 = arith.constant 0 : i32
    %c0_i32_1 = arith.constant 0 : i32
    return %c0_i32, %c0_i32_0 : i32, i32
  }
  func.func @transform_7(%arg0: i32) -> (i32, i32) {
    %c0_i32 = arith.constant 0 : i32
    %c0_i32_0 = arith.constant 0 : i32
    %c0_i32_1 = arith.constant 0 : i32
    return %c0_i32, %c0_i32_0 : i32, i32
  }
  func.func @transform_8(%arg0: i32) -> (i32, i32) {
    %c0_i32 = arith.constant 0 : i32
    %c0_i32_0 = arith.constant 0 : i32
    %c0_i32_1 = arith.constant 0 : i32
    return %c0_i32, %c0_i32_0 : i32, i32
  }
  func.func @transform_9(%arg0: i32) -> (i32, i32) {
    %c0_i32 = arith.constant 0 : i32
    %c0_i32_0 = arith.constant 0 : i32
    return %c0_i32, %arg0 : i32, i32
  }
}

</mosaic_0001>

<bundles_post_ra>
// kernel: tpu_custom_call.1
= control target key start
LH: loop header
LB: loop body
LE: loop exit
PB: predicated region body
PF: predicated region fallthrough
CT: control target
= control target key end

     0   :  { %s4537_s0 = inlined_call_operand.vmem [shape: bf16[2,32,512], index: 0, kind: input, shape index: {}]   ;;  %s4538_s1 = inlined_call_operand.vmem [shape: bf16[256,32], index: 1, kind: input, shape index: {}]   ;;  %s4539_s2 = inlined_call_operand.vmem [shape: f32[256,1], index: 2, kind: input, shape index: {}]   ;;  %s4540_s3 = inlined_call_operand.vmem [shape: bf16[128,256], index: 3, kind: input, shape index: {}]   ;;  %s4541_s4 = inlined_call_operand.vmem [shape: f32[128,1], index: 4, kind: input, shape index: {}]   ;;  %s4542_s5 = inlined_call_operand.vmem [shape: bf16[64,128], index: 5, kind: input, shape index: {}]   ;;  %s4543_s6 = inlined_call_operand.vmem [shape: f32[64,1], index: 6, kind: input, shape index: {}]   ;;  %s4544_s7 = inlined_call_operand.vmem [shape: f32[64,1], index: 7, kind: input, shape index: {}]   ;;  %s4545_s8 = inlined_call_operand.<no memory space> [shape: f32[1,1], index: 8, kind: input, shape index: {}]   ;;  %s4546_s9 = inlined_call_operand.hbm [shape: f32[1,1024], index: 9, kind: output, shape index: {}]  }
   0x1   :  { %v14_v0 = vstv %s4545_s8 }
   0x2   :  { %15 = vst [vmem:[#allocation2] sm:$0x1] %v14_v0 }
   0x3   :  { %16 = vsyncpa [#allocation4], 0 }
   0x4   :  { %18 = vsyncpa [#allocation4 + $0x1], 0  ;;  %s2982_s11 = smov 0   ;;  %s2984_s12 = smov 0  }
   0x5   :  { %s2986_s13 = smov 0   ;;  %s2988_s14 = smov 0  }
   0x6 LB: > { %s3003_s8 = sadd.s32 4294967295, %s2926_s14   ;;  %s2505_s15 = sadd.s32 4294967294, %s2926_s14   ;;  %s2926_s14 = sphi %s2988_s14, %s4701_s14   ;;  %s2922_s13 = sphi %s2986_s13, %s4700_s13   ;;  %s2918_s12 = sphi %s2984_s12, %s4699_s12   ;;  %s2914_s11 = sphi %s2982_s11, %s4698_s11  }
   0x7   : > { %s3007_s16 = sadd.s32 1, %s2926_s14   ;;  %s225_s17 = sadd.s32 1, %s2922_s13 }
   0x8   : > { %s222_s18 = ssub.s32 %s2926_s14, %s3007_s16  ;;  %p235_p0 = scmp.ne.s32.totalorder %s2922_s13, %s2918_s12 }
   0x9   : > { %p223_p1 = scmp.eq.s32.totalorder %s222_s18, 0  ;;  %p236_p2 = scmp.eq.s32.totalorder %s3003_s8, 1 }
   0xa   : > { %p241_p3 = scmp.ne.s32.totalorder %s2918_s12, %s2914_s11  ;;  %p242_p4 = scmp.eq.s32.totalorder %s2505_s15, 1 }
   0xb   : > { %s3018_s19 = scalar_select %p223_p1, %s2922_s13, %s225_s17  }
   0xc   : > { %p3020_p5 = por %p236_p2, %p235_p0  ;;  %p3024_p6 = por %p242_p4, %p241_p3 }
   0xd   : > { %p2508_p7 = scmp.ge.s32.totalorder %s2926_s14, 1  ;;  %p292_p8 = scmp.lt.s32.totalorder %s2926_s14, 3 }
   0xf   : > { %p293_p9 = pnand %p2508_p7, %p292_p8 }
  0x11   : > { %296 = sbr.rel (%p293_p9) target bundleno = 1113 (0x459), region = 56 }
  0x16   : > { %v405_v1 = vld [vmem:[%s4539_s2 + $0xf0] sm:$0xff]  ;;  %v387_v3 = vld [vmem:[%s4539_s2 + $0x60] sm:$0xff]  ;;  %p328_p10 = scmp.lt.s32.totalorder %s3003_s8, 1  ;;  %v2928_v4 = vmov 0   ;;  %v406_v8 = vld [vmem:[%s4539_s2 + $0xf8] sm:$0xff]  ;;  %vm687_vm0 = vcmask 261120  }
  0x17   : > { %v389_v2 = vld [vmem:[%s4539_s2 + $0x70] sm:$0xff]  ;;  %2847 = vset.pattern.permute.xlu2 %v2928_v4  ;;  %2846 = vset.pattern.permute.xlu1 %v2928_v4  ;;  %v390_v13 = vld [vmem:[%s4539_s2 + $0x78] sm:$0xff]  ;;  %v388_v14 = vld [vmem:[%s4539_s2 + $0x68] sm:$0xff]  ;;  %s325_s25 = sand.u32 1, %s2918_s12   ;;  %s2757_s27 = sshll.u32 %s3003_s8, 2 }
  0x18   : > { %2845 = vset.pattern.permute.xlu0 %v2928_v4  ;;  %559 = vperm.xlu1 %2846, %v405_v1   ;;  %s329_s28 = scalar_select %p328_p10, %s3003_s8, 1  ;;  %v2769_v32 = vld [vmem:[%s4538_s1] sm:$0xff]  ;;  %v404_v33 = vld [vmem:[%s4539_s2 + $0xe8] sm:$0xff]  ;;  %v385_v35 = vld [vmem:[%s4539_s2 + $0x50] sm:$0xff] }
  0x19   : > { %479 = vperm.xlu0 %2845, %v389_v2   ;;  %469 = vperm.xlu2 %2847, %v387_v3   ;;  %v403_v34 = vld [vmem:[%s4539_s2 + $0xe0] sm:$0xff]  ;;  %v401_v36 = vld [vmem:[%s4539_s2 + $0xd0] sm:$0xff]  ;;  %v386_v37 = vld [vmem:[%s4539_s2 + $0x58] sm:$0xff]  ;;  %s4479_s26 = sshll.u32 %s325_s25, 2  ;;  %s2431_s17 = scalar_lea.sflag [#allocation4], %s325_s25 }
  0x1a   : > { %s2760_s29 = sshll.u32 %s329_s28, 6  ;;  %v402_v38 = vld [vmem:[%s4539_s2 + $0xd8] sm:$0xff]  ;;  %v2770_v39 = vld [vmem:[%s4538_s1 + $0x8] sm:$0xff]  ;;  %v399_v41 = vld [vmem:[%s4539_s2 + $0xc0] sm:$0xff]  ;;  %s327_s30 = scalar_lea.vmem [#allocation3], %s4479_s26 }
  0x1b   : > { %s3044_s15 = scalar_lea.vmem %s4537_s0, %s2760_s29  ;;  %v384_v40 = vld [vmem:[%s4539_s2 + $0x48] sm:$0xff]  ;;  %v383_v42 = vld [vmem:[%s4539_s2 + $0x40] sm:$0xff]  ;;  %v381_v43 = vld [vmem:[%s4539_s2 + $0x30] sm:$0xff]  ;;  %s2441_s29 = scalar_lea.hbm %s4546_s9, %s2757_s27 }
  0x1c   : > { %v2594_v5 = vld [vmem:[%s3044_s15 + $0x20] sm:$0xf]  ;;  %v2767_v6 = vld [vmem:[%s3044_s15 + $0x2c] sm:$0xf0]  ;;  %v2765_v7 = vld [vmem:[%s3044_s15 + $0x24] sm:$0xf] }
  0x1d   : > { %v2595_v9 = vor.u32 %v2767_v6, %v2594_v5  ;;  %v2596_v10 = vld [vmem:[%s3044_s15 + $0x30] sm:$0xf0]  ;;  %v2602_v11 = vld [vmem:[%s3044_s15 + $0x28] sm:$0xf]  ;;  %v2768_v12 = vld [vmem:[%s3044_s15 + $0x34] sm:$0xf0] }
  0x1e   : > { %v2599_v15 = vor.u32 %v2765_v7, %v2596_v10  ;;  %v2603_v16 = vor.u32 %v2768_v12, %v2602_v11  ;;  %v2766_v17 = vld [vmem:[%s3044_s15 + $0x2c] sm:$0xf]  ;;  %v2604_v18 = vld [vmem:[%s3044_s15 + $0x38] sm:$0xf0]  ;;  %v2578_v19 = vld [vmem:[%s3044_s15] sm:$0xf] }
  0x1f   : > { %742 = vmatpush.bf16.msra.mxu0 %v2595_v9  ;;  %v2607_v20 = vor.u32 %v2766_v17, %v2604_v18  ;;  %v2763_v21 = vld [vmem:[%s3044_s15 + $0xc] sm:$0xf0]  ;;  %v2761_v22 = vld [vmem:[%s3044_s15 + $0x4] sm:$0xf]  ;;  %v2580_v23 = vld [vmem:[%s3044_s15 + $0x10] sm:$0xf0] }
  0x20   : > { %831 = vmatpush.bf16.msra.mxu1 %v2599_v15  ;;  %920 = vmatpush.bf16.msra.mxu2 %v2603_v16  ;;  %v2579_v24 = vor.u32 %v2763_v21, %v2578_v19  ;;  %v2583_v25 = vor.u32 %v2761_v22, %v2580_v23  ;;  %v2586_v26 = vld [vmem:[%s3044_s15 + $0x8] sm:$0xf]  ;;  %v2764_v27 = vld [vmem:[%s3044_s15 + $0x14] sm:$0xf0]  ;;  %v2762_v28 = vld [vmem:[%s3044_s15 + $0xc] sm:$0xf] }
  0x21   : > { %1009 = vmatpush.bf16.msra.mxu3 %v2607_v20  ;;  %564 = vperm.xlu1 %2846, %v406_v8   ;;  %v2587_v29 = vor.u32 %v2764_v27, %v2586_v26  ;;  %v2588_v30 = vld [vmem:[%s3044_s15 + $0x18] sm:$0xf0]  ;;  %v400_v44 = vld [vmem:[%s4539_s2 + $0xc8] sm:$0xff]  ;;  %v2771_v46 = vld [vmem:[%s4538_s1 + $0x10] sm:$0xff]  ;;  %s4505_s10 = sshll.u32 %s327_s30, 4  ;;  %s2445_s15 = sshll.u32 %s2441_s29, 4  ;;  %s2444_s10 = int_to_ptr.vmem [resolvable:$true] %s4505_s10  ;;  %s2446_s15 = int_to_ptr.hbm [resolvable:$true] %s2445_s15 }
  0x22   : > { %484 = vperm.xlu0 %2845, %v390_v13   ;;  %474 = vperm.xlu2 %2847, %v388_v14   ;;  %v2591_v31 = vor.u32 %v2762_v28, %v2588_v30  ;;  %v382_v45 = vld [vmem:[%s4539_s2 + $0x38] sm:$0xff]  ;;  %v397_v48 = vld [vmem:[%s4539_s2 + $0xb0] sm:$0xff]  ;;  %v379_v49 = vld [vmem:[%s4539_s2 + $0x20] sm:$0xff]  ;;  %s2878_s18 = sshra.s32 %s2446_s15, 4  ;;  %s2884_s26 = scalar_lea.hbm %s4546_s9, 8  ;;  %s2879_s18 = int_to_ptr.hbm [resolvable:$true] %s2878_s18 }
  0x23   : > { %743 = vmatpush.bf16.msra.mxu0 %v2579_v24  ;;  %v398_v47 = vld [vmem:[%s4539_s2 + $0xb8] sm:$0xff]  ;;  %v395_v50 = vld [vmem:[%s4539_s2 + $0xa0] sm:$0xff]  ;;  %v380_v51 = vld [vmem:[%s4539_s2 + $0x28] sm:$0xff]  ;;  %s2880_s22 = scalar_lea.hbm %s2879_s18, 4  ;;  %p2885_p0 = scmp.lt.s32.totalorder %s2879_s18, %s4546_s9 }
  0x24   : > { %832 = vmatpush.bf16.msra.mxu1 %v2583_v25  ;;  %921 = vmatpush.bf16.msra.mxu2 %v2587_v29  ;;  %v396_v52 = vld [vmem:[%s4539_s2 + $0xa8] sm:$0xff]  ;;  %v2772_v53 = vld [vmem:[%s4538_s1 + $0x18] sm:$0xff]  ;;  %v393_v55 = vld [vmem:[%s4539_s2 + $0x90] sm:$0xff]  ;;  %p2881_p11 = scmp.ne.s32.totalorder %s2879_s18, %s2880_s22  ;;  %p2886_p1 = scmp.lt.s32.totalorder %s2884_s26, %s2880_s22 }
  0x25   : > { %1010 = vmatpush.bf16.msra.mxu3 %v2591_v31  ;;  %v378_v54 = vld [vmem:[%s4539_s2 + $0x18] sm:$0xff]  ;;  %v377_v56 = vld [vmem:[%s4539_s2 + $0x10] sm:$0xff]  ;;  %v375_v57 = vld [vmem:[%s4539_s2] sm:$0xff] }
  0x26   : > { %2608 = vmatmul.msk.bf16.vlgmr.msra.gmra.mxu0 %vm687_vm0, %v2769_v32  ;;  %v376_v58 = vld [vmem:[%s4539_s2 + $0x8] sm:$0xff]  ;;  %v2773_v59 = vld [vmem:[%s4538_s1 + $0x20] sm:$0xff]  ;;  %v394_v62 = vld [vmem:[%s4539_s2 + $0x98] sm:$0xff]  ;;  %p2882_p12 = pnand %p2881_p11, %p3020_p5  ;;  %p2887_p2 = por %p2886_p1, %p2885_p0 }
  0x27   : > { %2624 = vmatmul.msk.bf16.vlgmr.msra.gmra.mxu1 %vm687_vm0, %v2769_v32  ;;  %2640 = vmatmul.msk.bf16.vlgmr.msra.gmra.mxu2 %vm687_vm0, %v2769_v32  ;;  %v2774_v60 = vld [vmem:[%s4538_s1 + $0x28] sm:$0xff]  ;;  %v391_v0 = vld [vmem:[%s4539_s2 + $0x80] sm:$0xff]  ;;  %v2775_v2 = vld [vmem:[%s4538_s1 + $0x30] sm:$0xff] }
  0x28   : > { %2656 = vmatmul.msk.bf16.vlgmr.msra.gmra.mxu3 %vm687_vm0, %v2769_v32  ;;  %v392_v1 = vld [vmem:[%s4539_s2 + $0x88] sm:$0xff]  ;;  %v1315_v3 = vld [vmem:[%s4541_s4 + $0x78] sm:$0xff]  ;;  %v1312_v4 = vld [vmem:[%s4541_s4 + $0x60] sm:$0xff]  ;;  %p2883_p13 = pneg %p2882_p12 }
  0x29   : > { %554 = vperm.xlu1 %2846, %v404_v33   ;;  %v1310_v8 = vld [vmem:[%s4541_s4 + $0x50] sm:$0xff]  ;;  %v1311_v9 = vld [vmem:[%s4541_s4 + $0x58] sm:$0xff]  ;;  %v1309_v14 = vld [vmem:[%s4541_s4 + $0x48] sm:$0xff] }
  0x2a   : > { %549 = vperm.xlu0 %2845, %v403_v34   ;;  %459 = vperm.xlu2 %2847, %v385_v35   ;;  %v2776_v11 = vld [vmem:[%s4538_s1 + $0x38] sm:$0xff]  ;;  %v1306_v15 = vld [vmem:[%s4541_s4 + $0x30] sm:$0xff]  ;;  %v1304_v19 = vld [vmem:[%s4541_s4 + $0x20] sm:$0xff]  ;;  %p2888_p3 = pnand %p2887_p2, %p2883_p13 }
  0x2b   : > { %v1305_v20 = vld [vmem:[%s4541_s4 + $0x28] sm:$0xff]  ;;  %v2777_v21 = vld [vmem:[%s4538_s1 + $0x40] sm:$0xff]  ;;  %v1314_v25 = vld [vmem:[%s4541_s4 + $0x70] sm:$0xff] }
  0x2c   : > { %v1303_v28 = vld [vmem:[%s4541_s4 + $0x18] sm:$0xff]  ;;  %v1300_v29 = vld [vmem:[%s4541_s4] sm:$0xff]  ;;  %v1313_v34 = vld [vmem:[%s4541_s4 + $0x68] sm:$0xff] }
  0x31   : > { %539 = vperm.xlu1 %2846, %v401_v36  }
  0x32   : > { %464 = vperm.xlu0 %2845, %v386_v37   ;;  %544 = vperm.xlu2 %2847, %v402_v38   ;;  %v1972_v37 = vld [vmem:[%s4543_s6] sm:$0xff]  ;;  %v1973_v38 = vld [vmem:[%s4543_s6 + $0x8] sm:$0xff] }
  0x36   : > { %2609 = vmatmul.msk.bf16.gmra.mxu0 %vm687_vm0, %v2770_v39 }
  0x37   : > { %2625 = vmatmul.msk.bf16.gmra.mxu1 %vm687_vm0, %v2770_v39  ;;  %2641 = vmatmul.msk.bf16.gmra.mxu2 %vm687_vm0, %v2770_v39 }
  0x38   : > { %2657 = vmatmul.msk.bf16.gmra.mxu3 %vm687_vm0, %v2770_v39 }
  0x39   : > { %454 = vperm.xlu1 %2846, %v384_v40  }
  0x3a   : > { %529 = vperm.xlu2 %2847, %v399_v41   ;;  %449 = vperm.xlu0 %2845, %v383_v42   ;;  %v2778_v41 = vld [vmem:[%s4538_s1 + $0x48] sm:$0xff] }
  0x41   : > { %439 = vperm.xlu1 %2846, %v381_v43  }
  0x42   : > { %534 = vperm.xlu0 %2845, %v400_v44   ;;  %444 = vperm.xlu2 %2847, %v382_v45   ;;  %v1308_v45 = vld [vmem:[%s4541_s4 + $0x40] sm:$0xff] }
  0x46   : > { %2610 = vmatmul.msk.bf16.gmra.mxu0 %vm687_vm0, %v2771_v46 }
  0x47   : > { %2626 = vmatmul.msk.bf16.gmra.mxu1 %vm687_vm0, %v2771_v46  ;;  %2642 = vmatmul.msk.bf16.gmra.mxu2 %vm687_vm0, %v2771_v46 }
  0x48   : > { %2658 = vmatmul.msk.bf16.gmra.mxu3 %vm687_vm0, %v2771_v46 }
  0x49   : > { %524 = vperm.xlu1 %2846, %v398_v47  }
  0x4a   : > { %519 = vperm.xlu0 %2845, %v397_v48   ;;  %429 = vperm.xlu2 %2847, %v379_v49   ;;  %v1975_v48 = vld [vmem:[%s4543_s6 + $0x18] sm:$0xff]  ;;  %v2192_v49 = vld [vmem:[%s4544_s7] sm:$0xff] }
  0x51   : > { %509 = vperm.xlu1 %2846, %v395_v50  }
  0x52   : > { %434 = vperm.xlu0 %2845, %v380_v51   ;;  %514 = vperm.xlu2 %2847, %v396_v52  }
  0x56   : > { %2611 = vmatmul.msk.bf16.gmra.mxu0 %vm687_vm0, %v2772_v53 }
  0x57   : > { %2627 = vmatmul.msk.bf16.gmra.mxu1 %vm687_vm0, %v2772_v53  ;;  %2643 = vmatmul.msk.bf16.gmra.mxu2 %vm687_vm0, %v2772_v53 }
  0x58   : > { %2659 = vmatmul.msk.bf16.gmra.mxu3 %vm687_vm0, %v2772_v53 }
  0x59   : > { %424 = vperm.xlu1 %2846, %v378_v54  }
  0x5a   : > { %499 = vperm.xlu2 %2847, %v393_v55   ;;  %419 = vperm.xlu0 %2845, %v377_v56   ;;  %v1307_v55 = vld [vmem:[%s4541_s4 + $0x38] sm:$0xff] }
  0x61   : > { %409 = vperm.xlu1 %2846, %v375_v57  }
  0x62   : > { %414 = vperm.xlu2 %2847, %v376_v58   ;;  %504 = vperm.xlu0 %2845, %v394_v62   ;;  %v1976_v58 = vld [vmem:[%s4543_s6 + $0x20] sm:$0xff]  ;;  %v2779_v62 = vld [vmem:[%s4538_s1 + $0x50] sm:$0xff] }
  0x66   : > { %2612 = vmatmul.msk.bf16.gmra.mxu0 %vm687_vm0, %v2773_v59 }
  0x67   : > { %2628 = vmatmul.msk.bf16.gmra.mxu1 %vm687_vm0, %v2773_v59  ;;  %2644 = vmatmul.msk.bf16.gmra.mxu2 %vm687_vm0, %v2773_v59 }
  0x68   : > { %2660 = vmatmul.msk.bf16.gmra.mxu3 %vm687_vm0, %v2773_v59  ;;  %v2194_v59 = vld [vmem:[%s4544_s7 + $0x10] sm:$0xff] }
  0x69   : > { %494 = vperm.xlu1 %2846, %v392_v1  }
  0x6a   : > { %489 = vperm.xlu0 %2845, %v391_v0   ;;  %1388 = vperm.xlu2 %2847, %v1314_v25  }
  0x71   : > { %1378 = vperm.xlu1 %2846, %v1312_v4   ;;  %v1302_v4 = vld [vmem:[%s4541_s4 + $0x10] sm:$0xff] }
  0x72   : > { %1393 = vperm.xlu0 %2845, %v1315_v3   ;;  %1383 = vperm.xlu2 %2847, %v1313_v34  }
  0x73   : > { %v3178_v61 = vpop.permute.xlu2 %469 }
  0x76   : > { %2613 = vmatmul.msk.bf16.gmra.mxu0 %vm687_vm0, %v2774_v60 }
  0x77   : > { %2629 = vmatmul.msk.bf16.gmra.mxu1 %vm687_vm0, %v2774_v60  ;;  %2645 = vmatmul.msk.bf16.gmra.mxu2 %vm687_vm0, %v2774_v60 }
  0x78   : > { %2661 = vmatmul.msk.bf16.gmra.mxu3 %vm687_vm0, %v2774_v60 }
  0x79   : > { %1373 = vperm.xlu1 %2846, %v1311_v9  }
  0x7a   : > { %1368 = vperm.xlu0 %2845, %v1310_v8   ;;  %1358 = vperm.xlu2 %2847, %v1308_v45  }
  0x7c   : > { %v3187_v63 = vpop.permute.xlu2 %474 }
  0x81   : > { %1348 = vperm.xlu1 %2846, %v1306_v15  }
  0x82   : > { %1363 = vperm.xlu0 %2845, %v1309_v14   ;;  %1353 = vperm.xlu2 %2847, %v1307_v55   ;;  %v1978_v14 = vld [vmem:[%s4543_s6 + $0x30] sm:$0xff]  ;;  %v2197_v55 = vld [vmem:[%s4544_s7 + $0x28] sm:$0xff] }
  0x84   : > { %v3207_v5 = vpop.permute.xlu2 %459 }
  0x86   : > { %2614 = vmatmul.msk.bf16.gmra.mxu0 %vm687_vm0, %v2775_v2 }
  0x87   : > { %2630 = vmatmul.msk.bf16.gmra.mxu1 %vm687_vm0, %v2775_v2  ;;  %2646 = vmatmul.msk.bf16.gmra.mxu2 %vm687_vm0, %v2775_v2 }
  0x88   : > { %2662 = vmatmul.msk.bf16.gmra.mxu3 %vm687_vm0, %v2775_v2 }
  0x89   : > { %1343 = vperm.xlu1 %2846, %v1305_v20  }
  0x8a   : > { %v3210_v6 = vpop.permute.xlu1 %559  ;;  %1338 = vperm.xlu0 %2845, %v1304_v19   ;;  %1328 = vperm.xlu2 %2847, %v1302_v4  }
  0x8b   : > { %4582 = vst [vmem:[#allocation6_spill] sm:$0xff] %v3210_v6  ;;  %v3212_v7 = vpop.permute.xlu0 %479 }
  0x8c   : > { %v3220_v10 = vpop.permute.xlu2 %544 }
  0x8d   : > { %4583 = vst [vmem:[#allocation7_spill] sm:$0xff] %v3220_v10 }
  0x91   : > { %1318 = vperm.xlu1 %2846, %v1300_v29   ;;  %v1301_v29 = vld [vmem:[%s4541_s4 + $0x8] sm:$0xff] }
  0x92   : > { %1333 = vperm.xlu0 %2845, %v1303_v28   ;;  %1323 = vperm.xlu2 %2847, %v1301_v29  }
  0x93   : > { %v3225_v12 = vpop.permute.xlu1 %564 }
  0x94   : > { %4584 = vst [vmem:[#allocation8_spill] sm:$0xff] %v3225_v12  ;;  %v3227_v13 = vpop.permute.xlu0 %484  ;;  %v3241_v17 = vpop.permute.xlu2 %529 }
  0x95   : > { %4586 = vst [vmem:[#allocation10_spill] sm:$0xff] %v3241_v17 }
  0x96   : > { %2615 = vmatmul.msk.bf16.gmra.mxu0 %vm687_vm0, %v2776_v11 }
  0x97   : > { %2631 = vmatmul.msk.bf16.gmra.mxu1 %vm687_vm0, %v2776_v11  ;;  %2647 = vmatmul.msk.bf16.gmra.mxu2 %vm687_vm0, %v2776_v11 }
  0x98   : > { %2663 = vmatmul.msk.bf16.gmra.mxu3 %vm687_vm0, %v2776_v11  ;;  %v2195_v11 = vld [vmem:[%s4544_s7 + $0x18] sm:$0xff] }
  0x99   : > { %1987 = vperm.xlu1 %2846, %v1973_v38  }
  0x9a   : > { %1982 = vperm.xlu0 %2845, %v1972_v37  }
  0x9b   : > { %v3239_v16 = vpop.permute.xlu1 %554 }
  0x9c   : > { %4585 = vst [vmem:[#allocation9_spill] sm:$0xff] %v3239_v16  ;;  %v3243_v18 = vpop.permute.xlu0 %549  ;;  %v3265_v27 = vpop.permute.xlu2 %444 }
  0x9d   : > { %4587 = vst [vmem:[#allocation11_spill] sm:$0xff] %v3243_v18 }
  0xa1   : > { %2202 = vperm.xlu1 %2846, %v2192_v49   ;;  %v1979_v49 = vld [vmem:[%s4543_s6 + $0x38] sm:$0xff] }
  0xa2   : > { %1997 = vperm.xlu0 %2845, %v1975_v48  }
  0xa3   : > { %v3254_v22 = vpop.permute.xlu1 %539  ;;  %v3256_v23 = vpop.f32.mrf.mxu0 }
  0xa4   : > { %4588 = vst [vmem:[#allocation12_spill] sm:$0xff] %v3254_v22  ;;  %v3258_v24 = vpop.permute.xlu0 %464  ;;  %v3263_v26 = vpop.f32.mrf.mxu1 }
  0xa5   : > { %v3298_v39 = vpop.permute.xlu2 %429 }
  0xa6   : > { %2616 = vmatmul.msk.bf16.gmra.mxu0 %vm687_vm0, %v2777_v21 }
  0xa7   : > { %2632 = vmatmul.msk.bf16.gmra.mxu1 %vm687_vm0, %v2777_v21  ;;  %2648 = vmatmul.msk.bf16.gmra.mxu2 %vm687_vm0, %v2777_v21 }
  0xa8   : > { %2664 = vmatmul.msk.bf16.gmra.mxu3 %vm687_vm0, %v2777_v21 }
  0xa9   : > { %2212 = vperm.xlu1 %2846, %v2194_v59  }
  0xaa   : > { %v3277_v30 = vpop.f32.mrf.mxu2  ;;  %2002 = vperm.xlu0 %2845, %v1976_v58  }
  0xab   : > { %v3279_v31 = vpop.f32.mrf.mxu3  ;;  %v3281_v32 = vpop.permute.xlu1 %454 }
  0xac   : > { %v3283_v33 = vpop.permute.xlu0 %449  ;;  %v3288_v35 = vpop.f32.mrf.mxu0 }
  0xad   : > { %v3290_v36 = vpop.f32.mrf.mxu1  ;;  %v3324_v50 = vpop.permute.xlu2 %514 }
  0xae   : > { %4590 = vst [vmem:[#allocation14_spill] sm:$0xff] %v3324_v50 }
  0xb1   : > { %2012 = vperm.xlu1 %2846, %v1978_v14  }
  0xb2   : > { %v3300_v40 = vpop.f32.mrf.mxu2  ;;  %2217 = vperm.xlu0 %2845, %v2195_v11  }
  0xb3   : > { %v3305_v42 = vpop.f32.mrf.mxu3  ;;  %v3307_v43 = vpop.permute.xlu1 %439 }
  0xb4   : > { %v3309_v44 = vpop.permute.xlu0 %534  ;;  %v750_v46 = vpop.f32.mrf.mxu0 }
  0xb5   : > { %4589 = vst [vmem:[#allocation13_spill] sm:$0xff] %v3309_v44  ;;  %v839_v47 = vpop.f32.mrf.mxu1  ;;  %v3352_v2 = vpop.permute.xlu2 %499  ;;  %v2783_v44 = vld [vmem:[%s4538_s1 + $0x70] sm:$0xff] }
  0xb6   : > { %2617 = vmatmul.msk.bf16.gmra.mxu0 %vm687_vm0, %v2778_v41  ;;  %4594 = vst [vmem:[#allocation18_spill] sm:$0xff] %v3352_v2 }
  0xb7   : > { %2633 = vmatmul.msk.bf16.gmra.mxu1 %vm687_vm0, %v2778_v41  ;;  %2649 = vmatmul.msk.bf16.gmra.mxu2 %vm687_vm0, %v2778_v41 }
  0xb8   : > { %2665 = vmatmul.msk.bf16.gmra.mxu3 %vm687_vm0, %v2778_v41 }
  0xb9   : > { %2227 = vperm.xlu1 %2846, %v2197_v55  }
  0xba   : > { %v3326_v51 = vpop.f32.mrf.mxu2  ;;  %2017 = vperm.xlu0 %2845, %v1979_v49   ;;  %v1974_v49 = vld [vmem:[%s4543_s6 + $0x10] sm:$0xff] }
  0xbb   : > { %v3328_v52 = vpop.f32.mrf.mxu3  ;;  %v3330_v53 = vpop.permute.xlu1 %524  ;;  %1992 = vperm.xlu2 %2847, %v1974_v49  }
  0xbc   : > { %4591 = vst [vmem:[#allocation15_spill] sm:$0xff] %v3330_v53  ;;  %v3332_v54 = vpop.permute.xlu0 %519  ;;  %v752_v56 = vpop.f32.mrf.mxu0 }
  0xbd   : > { %4592 = vst [vmem:[#allocation16_spill] sm:$0xff] %v3332_v54  ;;  %v841_v57 = vpop.f32.mrf.mxu1  ;;  %v3392_v59 = vpop.permute.xlu2 %414 }
  0xc2   : > { %v3343_v60 = vpop.f32.mrf.mxu2 }
  0xc3   : > { %v3348_v0 = vpop.f32.mrf.mxu3  ;;  %v3350_v1 = vpop.permute.xlu1 %509 }
  0xc4   : > { %4593 = vst [vmem:[#allocation17_spill] sm:$0xff] %v3350_v1  ;;  %v3354_v3 = vpop.permute.xlu0 %434  ;;  %v755_v8 = vpop.f32.mrf.mxu0  ;;  %v2198_v1 = vld [vmem:[%s4544_s7 + $0x30] sm:$0xff] }
  0xc5   : > { %v844_v9 = vpop.f32.mrf.mxu1  ;;  %v756_v21 = vadd.f32 %v755_v8, %v3298_v39 }
  0xc6   : > { %2618 = vmatmul.msk.bf16.gmra.mxu0 %vm687_vm0, %v2779_v62  ;;  %v845_v25 = vadd.f32 %v844_v9, %v3298_v39 }
  0xc7   : > { %2634 = vmatmul.msk.bf16.gmra.mxu1 %vm687_vm0, %v2779_v62  ;;  %2650 = vmatmul.msk.bf16.gmra.mxu2 %vm687_vm0, %v2779_v62  ;;  %v1108_v4 = vmax.f32 %v756_v21, 0.0 }
  0xc8   : > { %2666 = vmatmul.msk.bf16.gmra.mxu3 %vm687_vm0, %v2779_v62  ;;  %v1109_v8 = vmax.f32 %v845_v25, 0.0 }
  0xca   : > { %v3369_v15 = vpop.f32.mrf.mxu2 }
  0xcb   : > { %v3371_v19 = vpop.f32.mrf.mxu3  ;;  %v3373_v20 = vpop.permute.xlu1 %424 }
  0xcc   : > { %v3377_v28 = vpop.permute.xlu0 %419  ;;  %v753_v34 = vadd.f32 %v752_v56, %v3373_v20  ;;  %v757_v37 = vpop.f32.mrf.mxu0 }
  0xcd   : > { %v846_v38 = vpop.f32.mrf.mxu1  ;;  %v751_v41 = vadd.f32 %v750_v46, %v3377_v28  ;;  %v758_v45 = vadd.f32 %v757_v37, %v3354_v3  ;;  %v840_v62 = vadd.f32 %v839_v47, %v3377_v28  ;;  %v842_v46 = vadd.f32 %v841_v57, %v3373_v20 }
  0xce   : > { %v847_v48 = vadd.f32 %v846_v38, %v3354_v3  ;;  %v1104_v58 = vmax.f32 %v753_v34, 0.0  ;;  %v2780_v34 = vld [vmem:[%s4538_s1 + $0x58] sm:$0xff]  ;;  %v748_v57 = vadd.f32 %v3288_v35, %v3392_v59 }
  0xcf   : > { %v1100_v56 = vmax.f32 %v751_v41, 0.0  ;;  %v1112_v9 = vmax.f32 %v758_v45, 0.0  ;;  %v1101_v29 = vmax.f32 %v840_v62, 0.0  ;;  %v1105_v37 = vmax.f32 %v842_v46, 0.0  ;;  %v2199_v62 = vld [vmem:[%s4544_s7 + $0x38] sm:$0xff] }
  0xd0   : > { %v1113_v11 = vmax.f32 %v847_v48, 0.0  ;;  %v837_v48 = vadd.f32 %v3290_v36, %v3392_v59  ;;  %v2324_v36 = vld [vmem:[#allocation2] sm:$0x1]  ;;  %2237 = vperm.xlu0 %2845, %v2199_v62  }
  0xd1   : > { %v3396_v14 = vpack.c.bf16 %v1104_v58, %v1100_v56  ;;  %v3403_v41 = vpack.c.bf16 %v1112_v9, %v1108_v4  ;;  %v3413_v45 = vpack.c.bf16 %v1105_v37, %v1101_v29  ;;  %v1096_v4 = vmax.f32 %v748_v57, 0.0  ;;  %2327 = vperm.xlu1 %2846, %v2324_v36  }
  0xd2   : > { %v3398_v38 = vpop.f32.mrf.mxu2  ;;  %v3405_v47 = vpack.c.bf16 %v1113_v11, %v1109_v8  ;;  %v1097_v8 = vmax.f32 %v837_v48, 0.0 }
  0xd3   : > { %4595 = vst [vmem:[#allocation19_spill] sm:$0xff] %v3396_v14  ;;  %v3409_v21 = vpop.f32.mrf.mxu3  ;;  %v3411_v25 = vpop.permute.xlu1 %409 }
  0xd4   : > { %4596 = vst [vmem:[#allocation20_spill] sm:$0xff] %v3413_v45  ;;  %v746_v55 = vadd.f32 %v3256_v23, %v3411_v25  ;;  %v760_v58 = vpop.f32.mrf.mxu0  ;;  %v835_v35 = vadd.f32 %v3263_v26, %v3411_v25 }
  0xd5   : > { %v849_v56 = vpop.f32.mrf.mxu1  ;;  %v761_v37 = vadd.f32 %v760_v58, %v3307_v43  ;;  %v2781_v58 = vld [vmem:[%s4538_s1 + $0x60] sm:$0xff] }
  0xd6   : > { %2619 = vmatmul.msk.bf16.gmra.mxu0 %vm687_vm0, %v2780_v34  ;;  %v1092_v46 = vmax.f32 %v746_v55, 0.0  ;;  %v1093_v23 = vmax.f32 %v835_v35, 0.0  ;;  %v850_v57 = vadd.f32 %v849_v56, %v3307_v43  ;;  %v2193_v35 = vld [vmem:[%s4544_s7 + $0x8] sm:$0xff] }
  0xd7   : > { %2635 = vmatmul.msk.bf16.gmra.mxu1 %vm687_vm0, %v2780_v34  ;;  %2651 = vmatmul.msk.bf16.gmra.mxu2 %vm687_vm0, %v2780_v34  ;;  %v1116_v62 = vmax.f32 %v761_v37, 0.0  ;;  %v1977_v37 = vld [vmem:[%s4543_s6 + $0x28] sm:$0xff] }
  0xd8   : > { %2667 = vmatmul.msk.bf16.gmra.mxu3 %vm687_vm0, %v2780_v34  ;;  %v3431_v9 = vpack.c.bf16 %v1096_v4, %v1092_v46  ;;  %v3433_v26 = vpack.c.bf16 %v1097_v8, %v1093_v23  ;;  %2207 = vperm.xlu2 %2847, %v2193_v35   ;;  %v1117_v36 = vmax.f32 %v850_v57, 0.0 }
  0xda   : > { %4597 = vst [vmem:[#allocation21_spill] sm:$0xff] %v3431_v9  ;;  %v3435_v11 = vpop.f32.mrf.mxu2 }
  0xdb   : > { %4598 = vst [vmem:[#allocation22_spill] sm:$0xff] %v3433_v26  ;;  %v3437_v29 = vpop.f32.mrf.mxu3 }
  0xdc   : > { %v762_v49 = vpop.f32.mrf.mxu0 }
  0xdd   : > { %v851_v55 = vpop.f32.mrf.mxu1  ;;  %v763_v48 = vadd.f32 %v762_v49, %v3265_v27 }
  0xde   : > { %v852_v34 = vadd.f32 %v851_v55, %v3265_v27 }
  0xdf   : > { %v1120_v46 = vmax.f32 %v763_v48, 0.0 }
  0xe0   : > { %v1121_v4 = vmax.f32 %v852_v34, 0.0  ;;  %2007 = vperm.xlu2 %2847, %v1977_v37  }
  0xe1   : > { %v3451_v56 = vpack.c.bf16 %v1120_v46, %v1116_v62  ;;  %v2196_v62 = vld [vmem:[%s4544_s7 + $0x20] sm:$0xff]  ;;  %v2782_v46 = vld [vmem:[%s4538_s1 + $0x68] sm:$0xff] }
  0xe2   : > { %v3446_v23 = vpop.f32.mrf.mxu2  ;;  %v3453_v8 = vpack.c.bf16 %v1121_v4, %v1117_v36 }
  0xe3   : > { %v3455_v49 = vpop.f32.mrf.mxu3 }
  0xe4   : > { %v3457_v55 = vpop.f32.mrf.mxu0 }
  0xe5   : > { %v3459_v2 = vpop.f32.mrf.mxu1 }
  0xe6   : > { %2620 = vmatmul.msk.bf16.gmra.mxu0 %vm687_vm0, %v2781_v58 }
  0xe7   : > { %2636 = vmatmul.msk.bf16.gmra.mxu1 %vm687_vm0, %v2781_v58  ;;  %2652 = vmatmul.msk.bf16.gmra.mxu2 %vm687_vm0, %v2781_v58 }
  0xe8   : > { %2668 = vmatmul.msk.bf16.gmra.mxu3 %vm687_vm0, %v2781_v58  ;;  %2222 = vperm.xlu2 %2847, %v2196_v62  }
  0xea   : > { %v3468_v57 = vpop.f32.mrf.mxu2 }
  0xeb   : > { %4599 = vst [vmem:[#allocation23_spill] sm:$0xff] %v3468_v57  ;;  %v3470_v48 = vpop.f32.mrf.mxu3 }
  0xec   : > { %4600 = vst [vmem:[#allocation24_spill] sm:$0xff] %v3470_v48  ;;  %v3472_v34 = vpop.f32.mrf.mxu0 }
  0xed   : > { %v3474_v35 = vpop.f32.mrf.mxu1 }
  0xf0   : > { %2232 = vperm.xlu2 %2847, %v2198_v1   ;;  %v1013_v1 = vadd.f32 %v3279_v31, %v3411_v25  ;;  %v924_v31 = vadd.f32 %v3277_v30, %v3411_v25 }
  0xf2   : > { %v3479_v36 = vpop.f32.mrf.mxu2  ;;  %v1095_v16 = vmax.f32 %v1013_v1, 0.0  ;;  %v1094_v48 = vmax.f32 %v924_v31, 0.0  ;;  %v929_v31 = vadd.f32 %v3326_v51, %v3377_v28 }
  0xf3   : > { %4601 = vst [vmem:[#allocation25_spill] sm:$0xff] %v3479_v36  ;;  %v3484_v4 = vpop.f32.mrf.mxu3 }
  0xf4   : > { %4602 = vst [vmem:[#allocation26_spill] sm:$0xff] %v3484_v4  ;;  %v3486_v58 = vpop.f32.mrf.mxu0 }
  0xf5   : > { %v3488_v37 = vpop.f32.mrf.mxu1 }
  0xf6   : > { %2621 = vmatmul.msk.bf16.gmra.mxu0 %vm687_vm0, %v2782_v46 }
  0xf7   : > { %2637 = vmatmul.msk.bf16.gmra.mxu1 %vm687_vm0, %v2782_v46  ;;  %2653 = vmatmul.msk.bf16.gmra.mxu2 %vm687_vm0, %v2782_v46 }
  0xf8   : > { %2669 = vmatmul.msk.bf16.gmra.mxu3 %vm687_vm0, %v2782_v46  ;;  %v1015_v46 = vadd.f32 %v3305_v42, %v3392_v59  ;;  %v926_v42 = vadd.f32 %v3300_v40, %v3392_v59 }
  0xfa   : > { %v3497_v62 = vpop.f32.mrf.mxu2  ;;  %v1099_v6 = vmax.f32 %v1015_v46, 0.0  ;;  %v1098_v57 = vmax.f32 %v926_v42, 0.0 }
  0xfb   : > { %4603 = vst [vmem:[#allocation27_spill] sm:$0xff] %v3497_v62  ;;  %v3499_v50 = vpop.f32.mrf.mxu3 }
  0xfc   : > { %4604 = vst [vmem:[#allocation28_spill] sm:$0xff] %v3499_v50  ;;  %v772_v54 = vpop.f32.mrf.mxu0  ;;  %v3524_v9 = vpack.c.bf16 %v1099_v6, %v1095_v16  ;;  %v3531_v46 = vpack.c.bf16 %v1098_v57, %v1094_v48  ;;  %v1020_v6 = vadd.f32 %v3348_v0, %v3373_v20  ;;  %v1018_v16 = vadd.f32 %v3328_v52, %v3377_v28 }
  0xfd   : > { %v861_v53 = vpop.f32.mrf.mxu1  ;;  %v931_v52 = vadd.f32 %v3343_v60, %v3373_v20  ;;  %v1102_v28 = vmax.f32 %v929_v31, 0.0 }
  0xfe   : > { %4607 = vst [vmem:[#allocation31_spill] sm:$0xff] %v3524_v9  ;;  %v1103_v25 = vmax.f32 %v1018_v16, 0.0  ;;  %v1107_v57 = vmax.f32 %v1020_v6, 0.0 }
  0xff   : > { %4608 = vst [vmem:[#allocation32_spill] sm:$0xff] %v3531_v46 }
 0x100   : > { %v3553_v9 = vpack.c.bf16 %v1107_v57, %v1103_v25  ;;  %v1106_v25 = vmax.f32 %v931_v52, 0.0  ;;  %v862_v57 = vadd.f32 %v861_v53, %v3258_v24  ;;  %v860_v53 = vadd.f32 %v3488_v37, %v3207_v5 }
 0x101   : > { %v934_v37 = vadd.f32 %v3369_v15, %v3298_v39  ;;  %v1030_v15 = vadd.f32 %v3455_v49, %v3265_v27 }
 0x102   : > { %v3501_v17 = vpop.f32.mrf.mxu2  ;;  %4609 = vst [vmem:[#allocation33_spill] sm:$0xff] %v3553_v9  ;;  %v3565_v62 = vpack.c.bf16 %v1106_v25, %v1102_v28 }
 0x103   : > { %4605 = vst [vmem:[#allocation29_spill] sm:$0xff] %v3501_v17  ;;  %v3506_v22 = vpop.f32.mrf.mxu3  ;;  %v1110_v49 = vmax.f32 %v934_v37, 0.0 }
 0x104   : > { %4606 = vst [vmem:[#allocation30_spill] sm:$0xff] %v3506_v22  ;;  %v775_v10 = vpop.f32.mrf.mxu0 }
 0x105   : > { %v864_v18 = vpop.f32.mrf.mxu1  ;;  %v776_v16 = vadd.f32 %v775_v10, %v3178_v61  ;;  %v1023_v10 = vadd.f32 %v3371_v19, %v3298_v39  ;;  %v857_v19 = vadd.f32 %v3474_v35, %v3281_v32  ;;  %v855_v35 = vadd.f32 %v3459_v2, %v3283_v33 }
 0x106   : > { %2622 = vmatmul.msk.bf16.gmra.mxu0 %vm687_vm0, %v2783_v44  ;;  %v865_v22 = vadd.f32 %v864_v18, %v3178_v61  ;;  %v1025_v18 = vadd.f32 %v3409_v21, %v3354_v3  ;;  %v1028_v39 = vadd.f32 %v3437_v29, %v3307_v43 }
 0x107   : > { %2638 = vmatmul.msk.bf16.gmra.mxu1 %vm687_vm0, %v2783_v44  ;;  %2654 = vmatmul.msk.bf16.gmra.mxu2 %vm687_vm0, %v2783_v44 }
 0x108   : > { %2670 = vmatmul.msk.bf16.gmra.mxu3 %vm687_vm0, %v2783_v44  ;;  %v2784_v44 = vld [vmem:[%s4538_s1 + $0x78] sm:$0xff]  ;;  %v1141_v52 = vmax.f32 %v865_v22, 0.0  ;;  %v1111_v22 = vmax.f32 %v1023_v10, 0.0  ;;  %v1119_v29 = vmax.f32 %v1028_v39, 0.0 }
 0x10a   : > { %v3516_v12 = vpop.f32.mrf.mxu2 }
 0x10b   : > { %v3518_v26 = vpop.f32.mrf.mxu3 }
 0x10c   : > { %v777_v4 = vpop.f32.mrf.mxu0 }
 0x10d   : > { %v866_v36 = vpop.f32.mrf.mxu1 }
 0x10e   : > { %v867_v6 = vadd.f32 %v866_v36, %v3187_v63 }
 0x110   : > { %v1145_v36 = vmax.f32 %v867_v6, 0.0  ;;  %v1137_v6 = vmax.f32 %v862_v57, 0.0  ;;  %v1125_v57 = vmax.f32 %v855_v35, 0.0  ;;  %v4620_v35 = vld [vmem:[#allocation19_spill] sm:$0xff] }
 0x112   : > { %v3526_v45 = vpop.f32.mrf.mxu2 }
 0x113   : > { %v3533_v1 = vpop.f32.mrf.mxu3 }
 0x114   : > { %v780_v40 = vpop.f32.mrf.mxu0 }
 0x115   : > { %v869_v59 = vpop.f32.mrf.mxu1  ;;  %v781_v48 = vadd.f32 %v780_v40, %v3212_v7 }
 0x116   : > { %2623 = vmatmul.msk.bf16.gmra.mxu0 %vm687_vm0, %v2784_v44  ;;  %v870_v42 = vadd.f32 %v869_v59, %v3212_v7 }
 0x117   : > { %2639 = vmatmul.msk.bf16.gmra.mxu1 %vm687_vm0, %v2784_v44  ;;  %2655 = vmatmul.msk.bf16.gmra.mxu2 %vm687_vm0, %v2784_v44  ;;  %v1148_v60 = vmax.f32 %v781_v48, 0.0 }
 0x118   : > { %2671 = vmatmul.msk.bf16.gmra.mxu3 %vm687_vm0, %v2784_v44  ;;  %v778_v44 = vadd.f32 %v777_v4, %v3187_v63  ;;  %v1149_v20 = vmax.f32 %v870_v42, 0.0  ;;  %v773_v4 = vadd.f32 %v772_v54, %v3258_v24  ;;  %v771_v54 = vadd.f32 %v3486_v58, %v3207_v5 }
 0x119   : > { %v1140_v42 = vmax.f32 %v776_v16, 0.0  ;;  %v1115_v16 = vmax.f32 %v1025_v18, 0.0  ;;  %vm2418_vm0 = vcmask 1040384  }
 0x11a   : > { %v3543_v30 = vpop.f32.mrf.mxu2  ;;  %v1144_v9 = vmax.f32 %v778_v44, 0.0  ;;  %v1136_v44 = vmax.f32 %v773_v4, 0.0 }
 0x11b   : > { %v3547_v0 = vpop.f32.mrf.mxu3 }
 0x11c   : > { %v782_v46 = vpop.f32.mrf.mxu0  ;;  %v1244_v58 = vpack.c.bf16 %v1144_v9, %v1140_v42  ;;  %v939_v9 = vadd.f32 %v3435_v11, %v3307_v43  ;;  %v3603_v11 = vpack.c.bf16 %v1115_v16, %v1111_v22 }
 0x11d   : > { %v871_v14 = vpop.f32.mrf.mxu1  ;;  %v783_v40 = vadd.f32 %v782_v46, %v3227_v13 }
 0x11e   : > { %v872_v59 = vadd.f32 %v871_v14, %v3227_v13  ;;  %v1118_v43 = vmax.f32 %v939_v9, 0.0 }
 0x11f   : > { %v1152_v17 = vmax.f32 %v783_v40, 0.0  ;;  %v1245_v40 = vpack.c.bf16 %v1145_v36, %v1141_v52  ;;  %v1123_v36 = vmax.f32 %v1030_v15, 0.0 }
 0x120   : > { %v1153_v51 = vmax.f32 %v872_v59, 0.0  ;;  %v936_v59 = vadd.f32 %v3398_v38, %v3354_v3  ;;  %v941_v3 = vadd.f32 %v3446_v23, %v3265_v27 }
 0x121   : > { %v1248_v46 = vpack.c.bf16 %v1152_v17, %v1148_v60  ;;  %v768_v17 = vadd.f32 %v3472_v34, %v3281_v32  ;;  %v766_v34 = vadd.f32 %v3457_v55, %v3283_v33  ;;  %v1132_v60 = vmax.f32 %v771_v54, 0.0 }
 0x122   : > { %v3563_v50 = vpop.f32.mrf.mxu2  ;;  %v1249_v14 = vpack.c.bf16 %v1153_v51, %v1149_v20  ;;  %v1133_v20 = vmax.f32 %v860_v53, 0.0  ;;  %v1129_v55 = vmax.f32 %v857_v19, 0.0  ;;  %v1122_v23 = vmax.f32 %v941_v3, 0.0 }
 0x123   : > { %v1049_v48 = vpop.f32.mrf.mxu3  ;;  %1476 = vmatpush.bf16.msrb.mxu0 %v1248_v46  ;;  %v1128_v38 = vmax.f32 %v768_v17, 0.0  ;;  %v1240_v2 = vpack.c.bf16 %v1136_v44, %v1132_v60  ;;  %v1124_v4 = vmax.f32 %v766_v34, 0.0  ;;  %v3611_v53 = vpack.c.bf16 %v1123_v36, %v1119_v29  ;;  %v4621_v60 = vld [vmem:[#allocation20_spill] sm:$0xff] }
 0x124   : > { %1574 = vmatpush.bf16.msrb.mxu2 %v1249_v14  ;;  %v3579_v31 = vpop.f32.mrf.mxu0  ;;  %v1241_v28 = vpack.c.bf16 %v1137_v6, %v1133_v20  ;;  %v1114_v14 = vmax.f32 %v936_v59, 0.0  ;;  %v1237_v18 = vpack.c.bf16 %v1129_v55, %v1125_v57  ;;  %v3609_v54 = vpack.c.bf16 %v1122_v23, %v1118_v43  ;;  %v2674_v20 = vld [vmem:[%s4540_s3] sm:$0xf]  ;;  %v4622_v55 = vld [vmem:[#allocation23_spill] sm:$0xff]  ;;  %v4625_v23 = vld [vmem:[#allocation26_spill] sm:$0xff] }
 0x125   : > { %v3581_v21 = vpop.f32.mrf.mxu1  ;;  %v1236_v10 = vpack.c.bf16 %v1128_v38, %v1124_v4  ;;  %v959_v19 = vadd.f32 %v3543_v30, %v3212_v7  ;;  %v1048_v44 = vadd.f32 %v3547_v0, %v3212_v7  ;;  %v961_v6 = vadd.f32 %v3563_v50, %v3227_v13  ;;  %v4624_v43 = vld [vmem:[#allocation25_spill] sm:$0xff] }
 0x126   : > { %v3615_v52 = vpack.c.bf16 %v1114_v14, %v1110_v49  ;;  %v956_v30 = vadd.f32 %v3526_v45, %v3187_v63  ;;  %v1045_v7 = vadd.f32 %v3533_v1, %v3187_v63  ;;  %v4618_v63 = vld [vmem:[#allocation29_spill] sm:$0xff]  ;;  %v946_v29 = vadd.f32 %v4624_v43, %v3281_v32  ;;  %v2698_v43 = vld [vmem:[%s4540_s3 + $0x30] sm:$0xf] }
 0x127   : > { %1477 = vmatpush.bf16.msrb.mxu0 %v1244_v58  ;;  %v1050_v58 = vadd.f32 %v1049_v48, %v3227_v13  ;;  %v1150_v13 = vmax.f32 %v959_v19, 0.0  ;;  %v1151_v50 = vmax.f32 %v1048_v44, 0.0  ;;  %v1154_v0 = vmax.f32 %v961_v6, 0.0 }
 0x128   : > { %1575 = vmatpush.bf16.msrb.mxu2 %v1245_v40  ;;  %v951_v1 = vadd.f32 %v4618_v63, %v3258_v24  ;;  %v1146_v9 = vmax.f32 %v956_v30, 0.0  ;;  %v1147_v39 = vmax.f32 %v1045_v7, 0.0  ;;  %v1035_v36 = vadd.f32 %v4625_v23, %v3281_v32  ;;  %v2682_v63 = vld [vmem:[%s4540_s3 + $0x10] sm:$0xf] }
 0x129   : > { %v1155_v48 = vmax.f32 %v1050_v58, 0.0  ;;  %v1250_v3 = vpack.c.bf16 %v1154_v0, %v1150_v13  ;;  %v1130_v30 = vmax.f32 %v946_v29, 0.0  ;;  %v2792_v29 = vld [vmem:[%s4540_s3 + $0x34] sm:$0xf0] }
 0x12a   : > { %v3599_v51 = vpop.f32.mrf.mxu2  ;;  %v1138_v19 = vmax.f32 %v951_v1, 0.0  ;;  %v1131_v7 = vmax.f32 %v1035_v36, 0.0  ;;  %v2788_v1 = vld [vmem:[%s4540_s3 + $0x14] sm:$0xf0] }
 0x12b   : > { %4610 = vst [vmem:[#allocation34_spill] sm:$0xff] %v3599_v51  ;;  %v3601_v25 = vpop.f32.mrf.mxu3  ;;  %1478 = vmatpush.bf16.msrb.mxu0 %v1240_v2  ;;  %v1251_v15 = vpack.c.bf16 %v1155_v48, %v1151_v50  ;;  %v944_v2 = vadd.f32 %v4622_v55, %v3283_v33  ;;  %v4648_v51 = vld [vmem:[#allocation8_spill] sm:$0xff] }
 0x12c   : > { %4611 = vst [vmem:[#allocation35_spill] sm:$0xff] %v3601_v25  ;;  %1576 = vmatpush.bf16.msrb.mxu2 %v1241_v28  ;;  %v3605_v46 = vpop.f32.mrf.mxu0  ;;  %v4623_v28 = vld [vmem:[#allocation24_spill] sm:$0xff] }
 0x12d   : > { %v3607_v27 = vpop.f32.mrf.mxu1  ;;  %v1033_v4 = vadd.f32 %v4623_v28, %v3283_v33  ;;  %v1126_v32 = vmax.f32 %v944_v2, 0.0 }
 0x12f   : > { %1479 = vmatpush.bf16.msrb.mxu0 %v1236_v10  ;;  %v4626_v10 = vld [vmem:[#allocation21_spill] sm:$0xff] }
 0x130   : > { %1577 = vmatpush.bf16.msrb.mxu2 %v1237_v18  ;;  %v4627_v18 = vld [vmem:[#allocation22_spill] sm:$0xff] }
 0x132   : > { %v3613_v42 = vpop.f32.mrf.mxu2 }
 0x133   : > { %4612 = vst [vmem:[#allocation36_spill] sm:$0xff] %v3613_v42  ;;  %v3617_v17 = vpop.f32.mrf.mxu3  ;;  %1480 = vmatpush.bf16.msrb.mxu0 %v3451_v56  ;;  %v954_v56 = vadd.f32 %v3516_v12, %v3178_v61  ;;  %v4615_v12 = vld [vmem:[#allocation27_spill] sm:$0xff] }
 0x134   : > { %4613 = vst [vmem:[#allocation37_spill] sm:$0xff] %v3617_v17  ;;  %1578 = vmatpush.bf16.msrb.mxu2 %v3453_v8  ;;  %v3628_v40 = vpop.f32.mrf.mxu0  ;;  %v1043_v8 = vadd.f32 %v3518_v26, %v3178_v61  ;;  %v949_v59 = vadd.f32 %v4615_v12, %v3207_v5  ;;  %v4616_v61 = vld [vmem:[#allocation28_spill] sm:$0xff]  ;;  %v1238_v12 = vpack.c.bf16 %v1130_v30, %v1126_v32  ;;  %v2794_v32 = vld [vmem:[%s4540_s3 + $0x44] sm:$0xf0] }
 0x135   : > { %v3630_v37 = vpop.f32.mrf.mxu1  ;;  %v1038_v26 = vadd.f32 %v4616_v61, %v3207_v5  ;;  %v1142_v16 = vmax.f32 %v954_v56, 0.0  ;;  %v2786_v5 = vld [vmem:[%s4540_s3 + $0x4] sm:$0xf0] }
 0x136   : > { %v1143_v34 = vmax.f32 %v1043_v8, 0.0  ;;  %v3670_v57 = vor.u32 %v2786_v5, %v2674_v20  ;;  %v1134_v49 = vmax.f32 %v949_v59, 0.0  ;;  %v1127_v8 = vmax.f32 %v1033_v4, 0.0  ;;  %v4647_v17 = vld [vmem:[#allocation9_spill] sm:$0xff] }
 0x137   : > { %1481 = vmatpush.bf16.msrb.mxu0 %v3403_v41  ;;  %v4619_v41 = vld [vmem:[#allocation30_spill] sm:$0xff]  ;;  %v1135_v14 = vmax.f32 %v1038_v26, 0.0  ;;  %v1246_v6 = vpack.c.bf16 %v1146_v9, %v1142_v16  ;;  %v3702_v16 = vor.u32 %v2788_v1, %v2682_v63  ;;  %v2690_v9 = vld [vmem:[%s4540_s3 + $0x20] sm:$0xf] }
 0x138   : > { %1579 = vmatpush.bf16.msrb.mxu2 %v3405_v47  ;;  %v1040_v47 = vadd.f32 %v4619_v41, %v3258_v24  ;;  %v1247_v33 = vpack.c.bf16 %v1147_v39, %v1143_v34  ;;  %v1242_v0 = vpack.c.bf16 %v1138_v19, %v1134_v49  ;;  %v1239_v59 = vpack.c.bf16 %v1131_v7, %v1127_v8  ;;  %v2790_v39 = vld [vmem:[%s4540_s3 + $0x24] sm:$0xf0] }
 0x139   : > { %4632 = vst [vmem:[#allocation20_spill] sm:$0xff] %v3702_v16 }
 0x13a   : > { %v3642_v22 = vpop.f32.mrf.mxu2  ;;  %v1139_v44 = vmax.f32 %v1040_v47, 0.0 }
 0x13b   : > { %4614 = vst [vmem:[#allocation38_spill] sm:$0xff] %v3642_v22  ;;  %v3648_v45 = vpop.f32.mrf.mxu3  ;;  %1482 = vmatpush.bf16.msrb.mxu0 %v4620_v35 }
 0x13c   : > { %4617 = vst [vmem:[#allocation27_spill] sm:$0xff] %v3648_v45  ;;  %1580 = vmatpush.bf16.msrb.mxu2 %v4621_v60  ;;  %v3662_v38 = vpop.f32.mrf.mxu0  ;;  %v1243_v48 = vpack.c.bf16 %v1139_v44, %v1135_v14 }
 0x13d   : > { %v3664_v24 = vpop.f32.mrf.mxu1 }
 0x13f   : > { %1483 = vmatpush.bf16.msrb.mxu0 %v4626_v10  ;;  %v3762_v10 = vor.u32 %v2792_v29, %v2698_v43 }
 0x140   : > { %1581 = vmatpush.bf16.msrb.mxu2 %v4627_v18 }
 0x142   : > { %v3678_v58 = vpop.f32.mrf.mxu2  ;;  %1484 = vmatmul.bf16.vlgmr.msrb.gmra.mxu0 %v3670_v57 }
 0x143   : > { %1672 = vmatpush.bf16.msra.mxu0 %v1250_v3  ;;  %4628 = vst [vmem:[#allocation28_spill] sm:$0xff] %v3678_v58  ;;  %v3680_v56 = vpop.f32.mrf.mxu3  ;;  %1582 = vmatmul.bf16.vlgmr.msrb.gmra.mxu2 %v3670_v57  ;;  %v4649_v58 = vld [vmem:[#allocation11_spill] sm:$0xff] }
 0x144   : > { %1770 = vmatpush.bf16.msra.mxu2 %v1251_v15  ;;  %4629 = vst [vmem:[#allocation29_spill] sm:$0xff] %v3680_v56  ;;  %v3684_v13 = vpop.f32.mrf.mxu0  ;;  %v3736_v15 = vor.u32 %v2790_v39, %v2690_v9  ;;  %v2796_v9 = vld [vmem:[%s4540_s3 + $0x54] sm:$0xf0] }
 0x145   : > { %v3686_v50 = vpop.f32.mrf.mxu1 }
 0x146   : > { %4640 = vst [vmem:[#allocation21_spill] sm:$0xff] %v3736_v15 }
 0x147   : > { %1673 = vmatpush.bf16.msra.mxu0 %v1246_v6 }
 0x148   : > { %1771 = vmatpush.bf16.msra.mxu2 %v1247_v33  ;;  %v2706_v33 = vld [vmem:[%s4540_s3 + $0x40] sm:$0xf] }
 0x149   : > { %v3776_v7 = vor.u32 %v2794_v32, %v2706_v33 }
 0x14a   : > { %v3688_v61 = vpop.f32.mrf.mxu2 }
 0x14b   : > { %1674 = vmatpush.bf16.msra.mxu0 %v1242_v0  ;;  %4630 = vst [vmem:[#allocation30_spill] sm:$0xff] %v3688_v61  ;;  %v3690_v26 = vpop.f32.mrf.mxu3 }
 0x14c   : > { %1772 = vmatpush.bf16.msra.mxu2 %v1243_v48  ;;  %4631 = vst [vmem:[#allocation19_spill] sm:$0xff] %v3690_v26  ;;  %v3698_v41 = vpop.f32.mrf.mxu0 }
 0x14d   : > { %v3700_v47 = vpop.f32.mrf.mxu1 }
 0x14f   : > { %1675 = vmatpush.bf16.msra.mxu0 %v1238_v12 }
 0x150   : > { %1773 = vmatpush.bf16.msra.mxu2 %v1239_v59 }
 0x152   : > { %v3706_v34 = vpop.f32.mrf.mxu2  ;;  %1489 = vmatmul.bf16.gmra.mxu0 %v3702_v16 }
 0x153   : > { %1676 = vmatpush.bf16.msra.mxu0 %v3609_v54  ;;  %4633 = vst [vmem:[#allocation23_spill] sm:$0xff] %v3706_v34  ;;  %v3708_v35 = vpop.f32.mrf.mxu3  ;;  %1587 = vmatmul.bf16.gmra.mxu2 %v3702_v16  ;;  %v4635_v54 = vld [vmem:[#allocation33_spill] sm:$0xff] }
 0x154   : > { %1774 = vmatpush.bf16.msra.mxu2 %v3611_v53  ;;  %4634 = vst [vmem:[#allocation24_spill] sm:$0xff] %v3708_v35  ;;  %v3712_v60 = vpop.f32.mrf.mxu0  ;;  %v2722_v16 = vld [vmem:[%s4540_s3 + $0x60] sm:$0xf] }
 0x155   : > { %v3714_v20 = vpop.f32.mrf.mxu1 }
 0x157   : > { %1677 = vmatpush.bf16.msra.mxu0 %v3615_v52 }
 0x158   : > { %1775 = vmatpush.bf16.msra.mxu2 %v3603_v11  ;;  %v4638_v11 = vld [vmem:[#allocation32_spill] sm:$0xff] }
 0x159   : > { %4643 = vst [vmem:[#allocation32_spill] sm:$0xff] %v3762_v10 }
 0x15a   : > { %v3720_v53 = vpop.f32.mrf.mxu2 }
 0x15b   : > { %1678 = vmatpush.bf16.msra.mxu0 %v3565_v62  ;;  %4636 = vst [vmem:[#allocation25_spill] sm:$0xff] %v3720_v53  ;;  %v3722_v5 = vpop.f32.mrf.mxu3  ;;  %v4639_v62 = vld [vmem:[#allocation31_spill] sm:$0xff] }
 0x15c   : > { %1776 = vmatpush.bf16.msra.mxu2 %v4635_v54  ;;  %4637 = vst [vmem:[#allocation26_spill] sm:$0xff] %v3722_v5  ;;  %v3730_v3 = vpop.f32.mrf.mxu0  ;;  %v2714_v54 = vld [vmem:[%s4540_s3 + $0x50] sm:$0xf] }
 0x15d   : > { %v3732_v52 = vpop.f32.mrf.mxu1  ;;  %4644 = vst [vmem:[#allocation31_spill] sm:$0xff] %v3776_v7 }
 0x15f   : > { %1679 = vmatpush.bf16.msra.mxu0 %v4638_v11 }
 0x160   : > { %1777 = vmatpush.bf16.msra.mxu2 %v4639_v62  ;;  %v3794_v62 = vor.u32 %v2796_v9, %v2714_v54  ;;  %v2798_v54 = vld [vmem:[%s4540_s3 + $0x64] sm:$0xf0] }
 0x161   : > { %v3816_v22 = vor.u32 %v2798_v54, %v2722_v16  ;;  %v4651_v16 = vld [vmem:[#allocation12_spill] sm:$0xff] }
 0x162   : > { %1494 = vmatmul.bf16.gmra.mxu0 %v3736_v15  ;;  %v3740_v55 = vpop.f32.mrf.mxu2  ;;  %4645 = vst [vmem:[#allocation39_spill] sm:$0xff] %v3794_v62 }
 0x163   : > { %1592 = vmatmul.bf16.gmra.mxu2 %v3736_v15  ;;  %4641 = vst [vmem:[#allocation22_spill] sm:$0xff] %v3740_v55  ;;  %v3742_v2 = vpop.f32.mrf.mxu3  ;;  %v4650_v55 = vld [vmem:[#allocation7_spill] sm:$0xff] }
 0x164   : > { %4642 = vst [vmem:[#allocation33_spill] sm:$0xff] %v3742_v2  ;;  %v3744_v28 = vpop.f32.mrf.mxu0 }
 0x165   : > { %v3746_v4 = vpop.f32.mrf.mxu1 }
 0x16a   : > { %v3758_v49 = vpop.f32.mrf.mxu2 }
 0x16b   : > { %v3760_v14 = vpop.f32.mrf.mxu3 }
 0x16c   : > { %v3754_v23 = vpop.f32.mrf.mxu0 }
 0x16d   : > { %v3756_v36 = vpop.f32.mrf.mxu1 }
 0x172   : > { %1499 = vmatmul.bf16.gmra.mxu0 %v3762_v10  ;;  %v3766_v44 = vpop.f32.mrf.mxu2 }
 0x173   : > { %1597 = vmatmul.bf16.gmra.mxu2 %v3762_v10  ;;  %v3768_v6 = vpop.f32.mrf.mxu3 }
 0x174   : > { %v810_v18 = vpop.f32.mrf.mxu0 }
 0x175   : > { %v899_v19 = vpop.f32.mrf.mxu1 }
 0x176   : > { %v900_v54 = vadd.f32 %v899_v19, %v4651_v16 }
 0x17a   : > { %v3778_v0 = vpop.f32.mrf.mxu2 }
 0x17b   : > { %v3780_v48 = vpop.f32.mrf.mxu3 }
 0x17c   : > { %v812_v8 = vpop.f32.mrf.mxu0 }
 0x17d   : > { %v901_v30 = vpop.f32.mrf.mxu1 }
 0x182   : > { %1504 = vmatmul.bf16.gmra.mxu0 %v3776_v7  ;;  %v3784_v63 = vpop.f32.mrf.mxu2 }
 0x183   : > { %1602 = vmatmul.bf16.gmra.mxu2 %v3776_v7  ;;  %v3786_v1 = vpop.f32.mrf.mxu3  ;;  %v4646_v7 = vld [vmem:[#allocation6_spill] sm:$0xff] }
 0x184   : > { %v815_v12 = vpop.f32.mrf.mxu0 }
 0x185   : > { %v904_v59 = vpop.f32.mrf.mxu1 }
 0x186   : > { %v905_v45 = vadd.f32 %v904_v59, %v4649_v58  ;;  %v811_v59 = vadd.f32 %v810_v18, %v4651_v16 }
 0x188   : > { %v1196_v19 = vmax.f32 %v811_v59, 0.0 }
 0x18a   : > { %v3798_v33 = vpop.f32.mrf.mxu2 }
 0x18b   : > { %v3800_v32 = vpop.f32.mrf.mxu3 }
 0x18c   : > { %v817_v39 = vpop.f32.mrf.mxu0 }
 0x18d   : > { %v906_v11 = vpop.f32.mrf.mxu1  ;;  %v818_v42 = vadd.f32 %v817_v39, %v4647_v17 }
 0x18e   : > { %v907_v25 = vadd.f32 %v906_v11, %v4647_v17  ;;  %v813_v11 = vadd.f32 %v812_v8, %v4650_v55 }
 0x18f   : > { %v1208_v5 = vmax.f32 %v818_v42, 0.0 }
 0x190   : > { %v1200_v42 = vmax.f32 %v813_v11, 0.0 }
 0x192   : > { %1509 = vmatmul.bf16.gmra.mxu0 %v3794_v62  ;;  %v3818_v35 = vpop.f32.mrf.mxu2 }
 0x193   : > { %1607 = vmatmul.bf16.gmra.mxu2 %v3794_v62  ;;  %v3820_v34 = vpop.f32.mrf.mxu3 }
 0x194   : > { %v820_v43 = vpop.f32.mrf.mxu0 }
 0x195   : > { %v909_v29 = vpop.f32.mrf.mxu1  ;;  %v821_v10 = vadd.f32 %v820_v43, %v4646_v7 }
 0x196   : > { %v910_v15 = vadd.f32 %v909_v29, %v4646_v7  ;;  %v816_v29 = vadd.f32 %v815_v12, %v4649_v58 }
 0x197   : > { %v1212_v26 = vmax.f32 %v821_v10, 0.0 }
 0x198   : > { %v1213_v61 = vmax.f32 %v910_v15, 0.0  ;;  %v1204_v10 = vmax.f32 %v816_v29, 0.0  ;;  %v1205_v15 = vmax.f32 %v905_v45, 0.0  ;;  %v1197_v45 = vmax.f32 %v900_v54, 0.0 }
 0x19a   : > { %v998_v11 = vpop.f32.mrf.mxu2 }
 0x19c   : > { %v822_v9 = vpop.f32.mrf.mxu0 }
 0x19d   : > { %v911_v62 = vpop.f32.mrf.mxu1  ;;  %v823_v56 = vadd.f32 %v822_v9, %v4648_v51  ;;  %v902_v9 = vadd.f32 %v901_v30, %v4650_v55  ;;  %v4653_v30 = vld [vmem:[#allocation10_spill] sm:$0xff] }
 0x19e   : > { %v912_v43 = vadd.f32 %v911_v62, %v4648_v51  ;;  %v1209_v62 = vmax.f32 %v907_v25, 0.0  ;;  %v895_v18 = vadd.f32 %v3746_v4, %v4653_v30 }
 0x19f   : > { %v1216_v2 = vmax.f32 %v823_v56, 0.0  ;;  %v4652_v56 = vld [vmem:[#allocation13_spill] sm:$0xff] }
 0x1a0   : > { %v1217_v39 = vmax.f32 %v912_v43, 0.0  ;;  %v808_v8 = vadd.f32 %v3754_v23, %v4652_v56  ;;  %v897_v25 = vadd.f32 %v3756_v36, %v4652_v56  ;;  %v806_v43 = vadd.f32 %v3744_v28, %v4653_v30  ;;  %v4654_v23 = vld [vmem:[#allocation15_spill] sm:$0xff] }
 0x1a1   : > { %v1280_v53 = vpack.c.bf16 %v1216_v2, %v1212_v26  ;;  %v1276_v26 = vpack.c.bf16 %v1208_v5, %v1204_v10  ;;  %v1277_v2 = vpack.c.bf16 %v1209_v62, %v1205_v15  ;;  %v803_v29 = vadd.f32 %v3730_v3, %v4654_v23  ;;  %v2730_v3 = vld [vmem:[%s4540_s3 + $0x70] sm:$0xf] }
 0x1a2   : > { %v1281_v12 = vpack.c.bf16 %v1217_v39, %v1213_v61  ;;  %1514 = vmatmul.bf16.gmra.mxu0 %v3816_v22  ;;  %v1201_v61 = vmax.f32 %v902_v9, 0.0  ;;  %v892_v36 = vadd.f32 %v3732_v52, %v4654_v23  ;;  %v1192_v5 = vmax.f32 %v808_v8, 0.0  ;;  %v1087_v9 = vpop.f32.mrf.mxu3  ;;  %v2800_v52 = vld [vmem:[%s4540_s3 + $0x74] sm:$0xf0]  ;;  %v4656_v15 = vld [vmem:[#allocation14_spill] sm:$0xff] }
 0x1a3   : > { %1612 = vmatmul.bf16.gmra.mxu2 %v3816_v22  ;;  %1525 = vmatpush.bf16.msrb.mxu1 %v1280_v53  ;;  %v3836_v53 = vpop.permute.xlu0 %504  ;;  %v1193_v39 = vmax.f32 %v897_v25, 0.0  ;;  %v1272_v28 = vpack.c.bf16 %v1200_v42, %v1196_v19  ;;  %v1188_v54 = vmax.f32 %v806_v43, 0.0  ;;  %v1189_v10 = vmax.f32 %v895_v18, 0.0 }
 0x1a4   : > { %1623 = vmatpush.bf16.msrb.mxu3 %v1281_v12  ;;  %v1273_v62 = vpack.c.bf16 %v1201_v61, %v1197_v45  ;;  %v4655_v12 = vld [vmem:[#allocation16_spill] sm:$0xff]  ;;  %v798_v8 = vadd.f32 %v3698_v41, %v4656_v15  ;;  %v1184_v25 = vmax.f32 %v803_v29, 0.0  ;;  %v793_v41 = vadd.f32 %v3662_v38, %v3836_v53  ;;  %v3866_v29 = vpop.permute.xlu1 %494 }
 0x1a5   : > { %v801_v4 = vadd.f32 %v3712_v60, %v4655_v12  ;;  %v890_v59 = vadd.f32 %v3714_v20, %v4655_v12  ;;  %v887_v60 = vadd.f32 %v3700_v47, %v4656_v15  ;;  %v1185_v20 = vmax.f32 %v892_v36, 0.0 }
 0x1a6   : > { %v1268_v42 = vpack.c.bf16 %v1192_v5, %v1188_v54  ;;  %v1269_v61 = vpack.c.bf16 %v1193_v39, %v1189_v10  ;;  %v882_v47 = vadd.f32 %v3664_v24, %v3836_v53  ;;  %v1176_v36 = vmax.f32 %v798_v8, 0.0  ;;  %v1000_v54 = vpop.f32.mrf.mxu2 }
 0x1a7   : > { %1526 = vmatpush.bf16.msrb.mxu1 %v1276_v26  ;;  %v3856_v26 = vor.u32 %v2800_v52, %v2730_v3  ;;  %v1180_v19 = vmax.f32 %v801_v4, 0.0  ;;  %v1181_v45 = vmax.f32 %v890_v59, 0.0  ;;  %v1177_v5 = vmax.f32 %v887_v60, 0.0 }
 0x1a8   : > { %1624 = vmatpush.bf16.msrb.mxu3 %v1277_v2  ;;  %v4657_v2 = vld [vmem:[#allocation17_spill] sm:$0xff]  ;;  %v1168_v52 = vmax.f32 %v793_v41, 0.0  ;;  %v1169_v8 = vmax.f32 %v882_v47, 0.0 }
 0x1a9   : > { %v796_v43 = vadd.f32 %v3684_v13, %v4657_v2  ;;  %v885_v18 = vadd.f32 %v3686_v50, %v4657_v2  ;;  %v1264_v39 = vpack.c.bf16 %v1184_v25, %v1180_v19  ;;  %v788_v50 = vadd.f32 %v3605_v46, %v3866_v29 }
 0x1aa   : > { %v1089_v10 = vpop.f32.mrf.mxu3  ;;  %v877_v46 = vadd.f32 %v3607_v27, %v3866_v29  ;;  %v1088_v27 = vadd.f32 %v1087_v9, %v4646_v7 }
 0x1ab   : > { %1527 = vmatpush.bf16.msrb.mxu1 %v1272_v28  ;;  %v1265_v28 = vpack.c.bf16 %v1185_v20, %v1181_v45  ;;  %v3868_v13 = vpop.permute.xlu0 %489  ;;  %v1172_v4 = vmax.f32 %v796_v43, 0.0  ;;  %v1173_v59 = vmax.f32 %v885_v18, 0.0  ;;  %v999_v18 = vadd.f32 %v998_v11, %v4646_v7  ;;  %v2785_v11 = vld [vmem:[%s4540_s3 + $0x4] sm:$0xf]  ;;  %v2676_v7 = vld [vmem:[%s4540_s3 + $0x8] sm:$0xf0] }
 0x1ac   : > { %1625 = vmatpush.bf16.msrb.mxu3 %v1273_v62  ;;  %v4658_v62 = vld [vmem:[#allocation18_spill] sm:$0xff]  ;;  %v786_v3 = vadd.f32 %v3579_v31, %v3868_v13  ;;  %v875_v20 = vadd.f32 %v3581_v21, %v3868_v13  ;;  %v1161_v19 = vmax.f32 %v877_v46, 0.0  ;;  %v996_v45 = vadd.f32 %v3818_v35, %v4647_v17 }
 0x1ad   : > { %v791_v38 = vadd.f32 %v3628_v40, %v4658_v62  ;;  %v880_v24 = vadd.f32 %v3630_v37, %v4658_v62  ;;  %v1260_v60 = vpack.c.bf16 %v1176_v36, %v1172_v4  ;;  %v1261_v25 = vpack.c.bf16 %v1177_v5, %v1173_v59 }
 0x1ae   : > { %v1001_v40 = vadd.f32 %v1000_v54, %v4648_v51  ;;  %v1090_v37 = vadd.f32 %v1089_v10, %v4648_v51  ;;  %v1156_v31 = vmax.f32 %v786_v3, 0.0  ;;  %v1085_v51 = vadd.f32 %v3820_v34, %v4647_v17 }
 0x1af   : > { %1528 = vmatpush.bf16.msrb.mxu1 %v1268_v42  ;;  %v1160_v42 = vmax.f32 %v788_v50, 0.0  ;;  %v1165_v43 = vmax.f32 %v880_v24, 0.0  ;;  %v1157_v5 = vmax.f32 %v875_v20, 0.0  ;;  %v994_v35 = vadd.f32 %v3798_v33, %v4649_v58 }
 0x1b0   : > { %1626 = vmatpush.bf16.msrb.mxu3 %v1269_v61  ;;  %v1164_v61 = vmax.f32 %v791_v38, 0.0  ;;  %v1218_v21 = vmax.f32 %v1001_v40, 0.0  ;;  %v1219_v36 = vmax.f32 %v1090_v37, 0.0  ;;  %v1083_v17 = vadd.f32 %v3800_v32, %v4649_v58  ;;  %v4661_v40 = vld [vmem:[#allocation22_spill] sm:$0xff] }
 0x1b1   : > { %v1257_v47 = vpack.c.bf16 %v1169_v8, %v1165_v43  ;;  %v1214_v34 = vmax.f32 %v999_v18, 0.0  ;;  %v1215_v9 = vmax.f32 %v1088_v27, 0.0  ;;  %v1080_v50 = vadd.f32 %v3786_v1, %v4650_v55 }
 0x1b2   : > { %1519 = vmatmul.bf16.gmra.mxu0 %v3856_v26  ;;  %v1256_v41 = vpack.c.bf16 %v1168_v52, %v1164_v61  ;;  %v1210_v38 = vmax.f32 %v996_v45, 0.0  ;;  %v1253_v24 = vpack.c.bf16 %v1161_v19, %v1157_v5  ;;  %v1211_v4 = vmax.f32 %v1085_v51, 0.0 }
 0x1b3   : > { %1617 = vmatmul.bf16.gmra.mxu2 %v3856_v26  ;;  %1529 = vmatpush.bf16.msrb.mxu1 %v1264_v39  ;;  %v1252_v39 = vpack.c.bf16 %v1160_v42, %v1156_v31  ;;  %v1282_v59 = vpack.c.bf16 %v1218_v21, %v1214_v34  ;;  %v1283_v54 = vpack.c.bf16 %v1219_v36, %v1215_v9  ;;  %v1206_v32 = vmax.f32 %v994_v35, 0.0  ;;  %v4664_v31 = vld [vmem:[#allocation19_spill] sm:$0xff]  ;;  %v4669_v34 = vld [vmem:[#allocation28_spill] sm:$0xff] }
 0x1b4   : > { %1627 = vmatpush.bf16.msrb.mxu3 %v1265_v28  ;;  %v991_v28 = vadd.f32 %v3784_v63, %v4650_v55  ;;  %v3906_v10 = vor.u32 %v2785_v11, %v2676_v7  ;;  %v989_v58 = vadd.f32 %v3778_v0, %v4651_v16  ;;  %v1078_v33 = vadd.f32 %v3780_v48, %v4651_v16  ;;  %v2684_v11 = vld [vmem:[%s4540_s3 + $0x18] sm:$0xf0]  ;;  %v4667_v7 = vld [vmem:[#allocation38_spill] sm:$0xff] }
 0x1b5   : > { %v1207_v63 = vmax.f32 %v1083_v17, 0.0  ;;  %v986_v55 = vadd.f32 %v3766_v44, %v4652_v56  ;;  %v1075_v1 = vadd.f32 %v3768_v6, %v4652_v56  ;;  %v1203_v46 = vmax.f32 %v1080_v50, 0.0  ;;  %v4659_v56 = vld [vmem:[#allocation25_spill] sm:$0xff]  ;;  %v4668_v17 = vld [vmem:[#allocation27_spill] sm:$0xff] }
 0x1b6   : > { %v1202_v3 = vmax.f32 %v991_v28, 0.0  ;;  %v1278_v0 = vpack.c.bf16 %v1210_v38, %v1206_v32  ;;  %v984_v48 = vadd.f32 %v3758_v49, %v4653_v30  ;;  %v1073_v44 = vadd.f32 %v3760_v14, %v4653_v30  ;;  %v4663_v30 = vld [vmem:[#allocation30_spill] sm:$0xff]  ;;  %v4670_v28 = vld [vmem:[#allocation29_spill] sm:$0xff] }
 0x1b7   : > { %1530 = vmatpush.bf16.msrb.mxu1 %v1260_v60  ;;  %v1279_v52 = vpack.c.bf16 %v1211_v4, %v1207_v63  ;;  %v1198_v16 = vmax.f32 %v989_v58, 0.0  ;;  %v1199_v6 = vmax.f32 %v1078_v33, 0.0  ;;  %v979_v8 = vadd.f32 %v4659_v56, %v4655_v12  ;;  %v4660_v60 = vld [vmem:[#allocation26_spill] sm:$0xff]  ;;  %v4675_v56 = vld [vmem:[#allocation20_spill] sm:$0xff] }
 0x1b8   : > { %1628 = vmatpush.bf16.msrb.mxu3 %v1261_v25  ;;  %v1068_v25 = vadd.f32 %v4660_v60, %v4655_v12  ;;  %v981_v37 = vadd.f32 %v4661_v40, %v4654_v23  ;;  %v1194_v49 = vmax.f32 %v986_v55, 0.0  ;;  %v1195_v42 = vmax.f32 %v1075_v1, 0.0  ;;  %v4665_v12 = vld [vmem:[#allocation23_spill] sm:$0xff]  ;;  %v4671_v32 = vld [vmem:[#allocation34_spill] sm:$0xff]  ;;  %v4673_v1 = vld [vmem:[#allocation36_spill] sm:$0xff] }
 0x1b9   : > { %v1274_v61 = vpack.c.bf16 %v1202_v3, %v1198_v16  ;;  %v1275_v14 = vpack.c.bf16 %v1203_v46, %v1199_v6  ;;  %v974_v43 = vadd.f32 %v4663_v30, %v4657_v2  ;;  %v1063_v18 = vadd.f32 %v4664_v31, %v4657_v2  ;;  %v2787_v2 = vld [vmem:[%s4540_s3 + $0x14] sm:$0xf]  ;;  %v2700_v30 = vld [vmem:[%s4540_s3 + $0x38] sm:$0xf0] }
 0x1ba   : > { %v1190_v27 = vmax.f32 %v984_v48, 0.0  ;;  %v1191_v19 = vmax.f32 %v1073_v44, 0.0  ;;  %v976_v45 = vadd.f32 %v4665_v12, %v4656_v15  ;;  %v1183_v51 = vmax.f32 %v1068_v25, 0.0 }
 0x1bb   : > { %1531 = vmatpush.bf16.msrb.mxu1 %v1256_v41  ;;  %v4666_v41 = vld [vmem:[#allocation24_spill] sm:$0xff]  ;;  %v1186_v21 = vmax.f32 %v981_v37, 0.0  ;;  %v969_v35 = vadd.f32 %v4667_v7, %v4658_v62  ;;  %v971_v9 = vadd.f32 %v4669_v34, %v3836_v53  ;;  %v1060_v50 = vadd.f32 %v4670_v28, %v3836_v53  ;;  %v4674_v53 = vld [vmem:[#allocation37_spill] sm:$0xff]  ;;  %v4028_v7 = vpop.permute.xlu2 %1388  ;;  %v2724_v28 = vld [vmem:[%s4540_s3 + $0x68] sm:$0xf0] }
 0x1bc   : > { %1629 = vmatpush.bf16.msrb.mxu3 %v1257_v47  ;;  %v1182_v47 = vmax.f32 %v979_v8, 0.0  ;;  %v1270_v5 = vpack.c.bf16 %v1194_v49, %v1190_v27  ;;  %v1174_v38 = vmax.f32 %v974_v43, 0.0  ;;  %v1178_v4 = vmax.f32 %v976_v45, 0.0  ;;  %v2692_v49 = vld [vmem:[%s4540_s3 + $0x28] sm:$0xf0]  ;;  %v4677_v27 = vld [vmem:[#allocation32_spill] sm:$0xff] }
 0x1bd   : > { %v3954_v33 = vor.u32 %v2787_v2, %v2684_v11  ;;  %v964_v63 = vadd.f32 %v4671_v32, %v3868_v13  ;;  %v966_v3 = vadd.f32 %v4673_v1, %v3866_v29  ;;  %v1055_v46 = vadd.f32 %v4674_v53, %v3866_v29  ;;  %v2793_v45 = vld [vmem:[%s4540_s3 + $0x44] sm:$0xf]  ;;  %v2716_v2 = vld [vmem:[%s4540_s3 + $0x58] sm:$0xf0]  ;;  %v4072_v1 = vpop.permute.xlu0 %1393 }
 0x1be   : > { %v1170_v48 = vmax.f32 %v971_v9, 0.0  ;;  %v1171_v44 = vmax.f32 %v1060_v50, 0.0  ;;  %v1262_v16 = vpack.c.bf16 %v1178_v4, %v1174_v38  ;;  %v2797_v9 = vld [vmem:[%s4540_s3 + $0x64] sm:$0xf] }
 0x1bf   : > { %1532 = vmatpush.bf16.msrb.mxu1 %v1252_v39  ;;  %v1271_v39 = vpack.c.bf16 %v1195_v42, %v1191_v19  ;;  %v1162_v60 = vmax.f32 %v966_v3, 0.0  ;;  %v1163_v29 = vmax.f32 %v1055_v46, 0.0  ;;  %v1485_v43 = vpop.f32.mrf.mxu0 }
 0x1c0   : > { %1630 = vmatpush.bf16.msrb.mxu3 %v1253_v24  ;;  %v1175_v24 = vmax.f32 %v1063_v18, 0.0 }
 0x1c2   : > { %1533 = vmatmul.bf16.vlgmr.msrb.gmra.mxu1 %v3906_v10  ;;  %1680 = vmatmul.bf16.vlgmr.msra.gmra.mxu0 %v3670_v57 }
 0x1c3   : > { %1721 = vmatpush.bf16.msra.mxu1 %v1282_v59  ;;  %1631 = vmatmul.bf16.vlgmr.msrb.gmra.mxu3 %v3906_v10  ;;  %v4044_v50 = vpop.permute.xlu2 %1383 }
 0x1c4   : > { %1819 = vmatpush.bf16.msra.mxu3 %v1283_v54  ;;  %1778 = vmatmul.bf16.vlgmr.msra.gmra.mxu2 %v3670_v57  ;;  %v4662_v57 = vld [vmem:[#allocation33_spill] sm:$0xff]  ;;  %v1266_v54 = vpack.c.bf16 %v1186_v21, %v1182_v47  ;;  %v4678_v21 = vld [vmem:[#allocation31_spill] sm:$0xff] }
 0x1c5   : > { %v1070_v20 = vadd.f32 %v4662_v57, %v4654_v23  ;;  %v1065_v23 = vadd.f32 %v4666_v41, %v4656_v15  ;;  %v1058_v15 = vadd.f32 %v4668_v17, %v4658_v62  ;;  %v4672_v62 = vld [vmem:[#allocation35_spill] sm:$0xff]  ;;  %v2708_v41 = vld [vmem:[%s4540_s3 + $0x48] sm:$0xf0]  ;;  %v4032_v17 = vpop.permute.xlu1 %1378 }
 0x1c6   : > { %v1053_v55 = vadd.f32 %v4672_v62, %v3868_v13  ;;  %v1158_v13 = vmax.f32 %v964_v63, 0.0  ;;  %v3986_v31 = vpop.f32.mrf.mxu2  ;;  %v2799_v62 = vld [vmem:[%s4540_s3 + $0x74] sm:$0xf] }
 0x1c7   : > { %1722 = vmatpush.bf16.msra.mxu1 %v1278_v0  ;;  %v1187_v36 = vmax.f32 %v1070_v20, 0.0  ;;  %v1179_v59 = vmax.f32 %v1065_v23, 0.0  ;;  %v1166_v0 = vmax.f32 %v969_v35, 0.0  ;;  %v2789_v20 = vld [vmem:[%s4540_s3 + $0x24] sm:$0xf]  ;;  %v3994_v19 = vpop.f32.mrf.mxu0  ;;  %v4004_v23 = vor.u32 %v2793_v45, %v2708_v41  ;;  %v4679_v35 = vld [vmem:[#allocation39_spill] sm:$0xff] }
 0x1c8   : > { %1820 = vmatpush.bf16.msra.mxu3 %v1279_v52  ;;  %v1167_v52 = vmax.f32 %v1058_v15, 0.0  ;;  %v1159_v8 = vmax.f32 %v1053_v55, 0.0  ;;  %v1254_v37 = vpack.c.bf16 %v1162_v60, %v1158_v13  ;;  %v3974_v42 = vor.u32 %v2789_v20, %v2692_v49  ;;  %v2732_v55 = vld [vmem:[%s4540_s3 + $0x78] sm:$0xf0] }
 0x1c9   : > { %v1267_v58 = vpack.c.bf16 %v1187_v36, %v1183_v51  ;;  %v1263_v6 = vpack.c.bf16 %v1179_v59, %v1175_v24  ;;  %v1258_v25 = vpack.c.bf16 %v1170_v48, %v1166_v0  ;;  %v4048_v24 = vor.u32 %v2797_v9, %v2724_v28 }
 0x1ca   : > { %v1259_v40 = vpack.c.bf16 %v1171_v44, %v1167_v52  ;;  %v1255_v57 = vpack.c.bf16 %v1163_v29, %v1159_v8  ;;  %v4074_v3 = vor.u32 %v2799_v62, %v2732_v55  ;;  %v4088_v52 = vpop.permute.xlu0 %1368 }
 0x1cb   : > { %1723 = vmatpush.bf16.msra.mxu1 %v1274_v61  ;;  %v4676_v61 = vld [vmem:[#allocation21_spill] sm:$0xff] }
 0x1cc   : > { %1821 = vmatpush.bf16.msra.mxu3 %v1275_v14  ;;  %v2791_v14 = vld [vmem:[%s4540_s3 + $0x34] sm:$0xf] }
 0x1cd   : > { %v3988_v18 = vor.u32 %v2791_v14, %v2700_v30  ;;  %v4046_v38 = vpop.permute.xlu1 %1373 }
 0x1ce   : > { %v3996_v12 = vpop.f32.mrf.mxu2 }
 0x1cf   : > { %1724 = vmatpush.bf16.msra.mxu1 %v1270_v5  ;;  %v4006_v47 = vpop.f32.mrf.mxu0 }
 0x1d0   : > { %1822 = vmatpush.bf16.msra.mxu3 %v1271_v39  ;;  %v2795_v39 = vld [vmem:[%s4540_s3 + $0x54] sm:$0xf] }
 0x1d1   : > { %v4024_v11 = vor.u32 %v2795_v39, %v2716_v2 }
 0x1d2   : > { %1538 = vmatmul.bf16.gmra.mxu1 %v3954_v33  ;;  %1685 = vmatmul.bf16.gmra.mxu0 %v4675_v56  ;;  %v4095_v13 = vpop.permute.xlu0 %1363 }
 0x1d3   : > { %1725 = vmatpush.bf16.msra.mxu1 %v1266_v54  ;;  %1636 = vmatmul.bf16.gmra.mxu3 %v3954_v33  ;;  %v4058_v54 = vpop.permute.xlu2 %1358 }
 0x1d4   : > { %1823 = vmatpush.bf16.msra.mxu3 %v1267_v58  ;;  %1783 = vmatmul.bf16.gmra.mxu2 %v4675_v56  ;;  %4680 = vst [vmem:[#allocation6_spill] sm:$0xff] %v4058_v54 }
 0x1d5   : > { %v4060_v58 = vpop.permute.xlu1 %1348 }
 0x1d6   : > { %v4008_v51 = vpop.f32.mrf.mxu2  ;;  %4681 = vst [vmem:[#allocation9_spill] sm:$0xff] %v4060_v58 }
 0x1d7   : > { %1726 = vmatpush.bf16.msra.mxu1 %v1262_v16  ;;  %v4014_v36 = vpop.f32.mrf.mxu0 }
 0x1d8   : > { %1824 = vmatpush.bf16.msra.mxu3 %v1263_v6 }
 0x1da   : > { %v4105_v49 = vpop.permute.xlu0 %1338 }
 0x1db   : > { %1727 = vmatpush.bf16.msra.mxu1 %v1258_v25  ;;  %4684 = vst [vmem:[#allocation7_spill] sm:$0xff] %v4105_v49 }
 0x1dc   : > { %1825 = vmatpush.bf16.msra.mxu3 %v1259_v40 }
 0x1dd   : > { %v4078_v53 = vpop.permute.xlu1 %1343 }
 0x1de   : > { %v4016_v5 = vpop.f32.mrf.mxu2  ;;  %4683 = vst [vmem:[#allocation11_spill] sm:$0xff] %v4078_v53 }
 0x1df   : > { %1728 = vmatpush.bf16.msra.mxu1 %v1254_v37  ;;  %v4034_v15 = vpop.f32.mrf.mxu0 }
 0x1e0   : > { %1826 = vmatpush.bf16.msra.mxu3 %v1255_v57 }
 0x1e2   : > { %1543 = vmatmul.bf16.gmra.mxu1 %v3974_v42  ;;  %1690 = vmatmul.bf16.gmra.mxu0 %v4676_v61  ;;  %v4123_v2 = vpop.permute.xlu0 %1333 }
 0x1e3   : > { %1641 = vmatmul.bf16.gmra.mxu3 %v3974_v42 }
 0x1e4   : > { %1788 = vmatmul.bf16.gmra.mxu2 %v4676_v61 }
 0x1e5   : > { %v4092_v44 = vpop.permute.xlu1 %1318 }
 0x1e6   : > { %v4036_v34 = vpop.f32.mrf.mxu2  ;;  %v1486_v16 = vadd.f32 %v1485_v43, %v4092_v44  ;;  %v1584_v8 = vadd.f32 %v3986_v31, %v4092_v44 }
 0x1e7   : > { %v4050_v4 = vpop.f32.mrf.mxu0 }
 0x1ee   : > { %v4052_v59 = vpop.f32.mrf.mxu2 }
 0x1ef   : > { %v4062_v32 = vpop.f32.mrf.mxu0 }
 0x1f2   : > { %1548 = vmatmul.bf16.gmra.mxu1 %v3988_v18  ;;  %1695 = vmatmul.bf16.gmra.mxu0 %v4677_v27 }
 0x1f3   : > { %1646 = vmatmul.bf16.gmra.mxu3 %v3988_v18 }
 0x1f4   : > { %1793 = vmatmul.bf16.gmra.mxu2 %v4677_v27 }
 0x1f6   : > { %v4064_v63 = vpop.f32.mrf.mxu2 }
 0x1f7   : > { %v4082_v46 = vpop.f32.mrf.mxu0 }
 0x1fe   : > { %v4084_v0 = vpop.f32.mrf.mxu2 }
 0x1ff   : > { %v4111_v14 = vpop.f32.mrf.mxu0 }
 0x202   : > { %1553 = vmatmul.bf16.gmra.mxu1 %v4004_v23  ;;  %1700 = vmatmul.bf16.gmra.mxu0 %v4678_v21 }
 0x203   : > { %1651 = vmatmul.bf16.gmra.mxu3 %v4004_v23 }
 0x204   : > { %1798 = vmatmul.bf16.gmra.mxu2 %v4678_v21 }
 0x207   : > { %v4127_v28 = vpop.f32.mrf.mxu0 }
 0x212   : > { %1558 = vmatmul.bf16.gmra.mxu1 %v4024_v11  ;;  %1705 = vmatmul.bf16.gmra.mxu0 %v4679_v35 }
 0x213   : > { %1656 = vmatmul.bf16.gmra.mxu3 %v4024_v11 }
 0x214   : > { %1803 = vmatmul.bf16.gmra.mxu2 %v4679_v35 }
 0x222   : > { %1563 = vmatmul.bf16.gmra.mxu1 %v4048_v24  ;;  %1710 = vmatmul.bf16.gmra.mxu0 %v3816_v22 }
 0x223   : > { %1661 = vmatmul.bf16.gmra.mxu3 %v4048_v24 }
 0x224   : > { %1808 = vmatmul.bf16.gmra.mxu2 %v3816_v22  ;;  %v4076_v22 = vpop.permute.xlu2 %1353 }
 0x225   : > { %4682 = vst [vmem:[#allocation8_spill] sm:$0xff] %v4076_v22 }
 0x22c   : > { %v4090_v48 = vpop.permute.xlu2 %1328 }
 0x22d   : > { %v1491_v43 = vadd.f32 %v4006_v47, %v4090_v48  ;;  %v1589_v39 = vadd.f32 %v4008_v51, %v4090_v48  ;;  %v1493_v47 = vadd.f32 %v4014_v36, %v4123_v2 }
 0x232   : > { %1568 = vmatmul.bf16.gmra.mxu1 %v4074_v3  ;;  %1715 = vmatmul.bf16.gmra.mxu0 %v3856_v26 }
 0x233   : > { %1666 = vmatmul.bf16.gmra.mxu3 %v4074_v3 }
 0x234   : > { %1813 = vmatmul.bf16.gmra.mxu2 %v3856_v26  ;;  %v4101_v26 = vpop.permute.xlu2 %1323 }
 0x235   : > { %v1488_v29 = vadd.f32 %v3994_v19, %v4101_v26  ;;  %v1586_v61 = vadd.f32 %v3996_v12, %v4101_v26  ;;  %v4119_v12 = vpop.f32.mrf.mxu2 }
 0x23f   : > { %v1534_v6 = vpop.f32.mrf.mxu1 }
 0x240   : > { %v1535_v56 = vadd.f32 %v1534_v6, %v1486_v16  ;;  %v1591_v6 = vadd.f32 %v4016_v5, %v4123_v2 }
 0x242   : > { %1729 = vmatmul.bf16.vlgmr.msra.gmra.mxu1 %v3906_v10  ;;  %v1868_v57 = vmax.f32 %v1535_v56, 0.0 }
 0x243   : > { %1827 = vmatmul.bf16.vlgmr.msra.gmra.mxu3 %v3906_v10 }
 0x246   : > { %v1632_v60 = vpop.f32.mrf.mxu3 }
 0x247   : > { %v1633_v25 = vadd.f32 %v1632_v60, %v1584_v8  ;;  %v1536_v40 = vpop.f32.mrf.mxu1  ;;  %v4133_v8 = vpop.f32.mrf.mxu2  ;;  %v1496_v60 = vadd.f32 %v4034_v15, %v4105_v49  ;;  %v1498_v15 = vadd.f32 %v4050_v4, %v4078_v53 }
 0x248   : > { %v1537_v37 = vadd.f32 %v1536_v40, %v1488_v29 }
 0x249   : > { %v1869_v19 = vmax.f32 %v1633_v25, 0.0 }
 0x24a   : > { %v1872_v20 = vmax.f32 %v1537_v37, 0.0 }
 0x24c   : > { %v4109_v10 = vpack.c.bf16 %v1872_v20, %v1868_v57  ;;  %v4137_v57 = vpop.f32.mrf.mxu0  ;;  %v1594_v20 = vadd.f32 %v4036_v34, %v4105_v49  ;;  %v1501_v34 = vadd.f32 %v4062_v32, %v4060_v58  ;;  %v1503_v32 = vadd.f32 %v4082_v46, %v4076_v22 }
 0x24e   : > { %v1634_v30 = vpop.f32.mrf.mxu3 }
 0x24f   : > { %v1635_v31 = vadd.f32 %v1634_v30, %v1586_v61  ;;  %v1539_v27 = vpop.f32.mrf.mxu1 }
 0x250   : > { %v1540_v41 = vadd.f32 %v1539_v27, %v1491_v43  ;;  %v4147_v43 = vpop.f32.mrf.mxu2 }
 0x251   : > { %v1873_v45 = vmax.f32 %v1635_v31, 0.0 }
 0x252   : > { %1734 = vmatmul.bf16.gmra.mxu1 %v3954_v33  ;;  %v1876_v16 = vmax.f32 %v1540_v41, 0.0 }
 0x253   : > { %1832 = vmatmul.bf16.gmra.mxu3 %v3954_v33  ;;  %v4117_v21 = vpack.c.bf16 %v1873_v45, %v1869_v19 }
 0x254   : > { %v4149_v41 = vpop.f32.mrf.mxu0 }
 0x255   : > { %4685 = vst [vmem:[#allocation12_spill] sm:$0xff] %v4117_v21 }
 0x256   : > { %v1637_v35 = vpop.f32.mrf.mxu3 }
 0x257   : > { %v1638_v9 = vadd.f32 %v1637_v35, %v1589_v39  ;;  %v1541_v62 = vpop.f32.mrf.mxu1 }
 0x258   : > { %v1542_v55 = vadd.f32 %v1541_v62, %v1493_v47 }
 0x259   : > { %v1877_v25 = vmax.f32 %v1638_v9, 0.0 }
 0x25a   : > { %v1880_v33 = vmax.f32 %v1542_v55, 0.0 }
 0x25c   : > { %v4131_v56 = vpack.c.bf16 %v1880_v33, %v1876_v16  ;;  %v4157_v16 = vpop.f32.mrf.mxu2 }
 0x25e   : > { %v1639_v51 = vpop.f32.mrf.mxu3 }
 0x25f   : > { %v1640_v29 = vadd.f32 %v1639_v51, %v1591_v6  ;;  %v1544_v36 = vpop.f32.mrf.mxu1  ;;  %v1515_v6 = vpop.f32.mrf.mxu0 }
 0x260   : > { %v1545_v37 = vadd.f32 %v1544_v36, %v1496_v60 }
 0x261   : > { %v1881_v40 = vmax.f32 %v1640_v29, 0.0 }
 0x262   : > { %1739 = vmatmul.bf16.gmra.mxu1 %v3974_v42  ;;  %v1884_v19 = vmax.f32 %v1545_v37, 0.0 }
 0x263   : > { %1837 = vmatmul.bf16.gmra.mxu3 %v3974_v42  ;;  %v4141_v5 = vpack.c.bf16 %v1881_v40, %v1877_v25  ;;  %v1596_v42 = vadd.f32 %v4052_v59, %v4078_v53  ;;  %v1599_v59 = vadd.f32 %v4064_v63, %v4060_v58  ;;  %v1506_v63 = vadd.f32 %v4111_v14, %v4058_v54 }
 0x264   : > { %v4167_v37 = vpop.f32.mrf.mxu2  ;;  %v1513_v53 = vadd.f32 %v4149_v41, %v4046_v38  ;;  %v1508_v41 = vadd.f32 %v4127_v28, %v4095_v13 }
 0x266   : > { %v1642_v61 = vpop.f32.mrf.mxu3 }
 0x267   : > { %v1643_v30 = vadd.f32 %v1642_v61, %v1594_v20  ;;  %v1546_v31 = vpop.f32.mrf.mxu1 }
 0x268   : > { %v1547_v27 = vadd.f32 %v1546_v31, %v1498_v15 }
 0x269   : > { %v1885_v9 = vmax.f32 %v1643_v30, 0.0  ;;  %v1517_v30 = vpop.f32.mrf.mxu0 }
 0x26a   : > { %v1888_v45 = vmax.f32 %v1547_v27, 0.0 }
 0x26c   : > { %v4153_v39 = vpack.c.bf16 %v1888_v45, %v1884_v19 }
 0x26e   : > { %v1644_v35 = vpop.f32.mrf.mxu3 }
 0x26f   : > { %v1645_v47 = vadd.f32 %v1644_v35, %v1596_v42  ;;  %v1549_v4 = vpop.f32.mrf.mxu1  ;;  %v1615_v42 = vpop.f32.mrf.mxu2 }
 0x270   : > { %v1550_v55 = vadd.f32 %v1549_v4, %v1501_v34 }
 0x271   : > { %v1889_v62 = vmax.f32 %v1645_v47, 0.0  ;;  %v1520_v47 = vpop.f32.mrf.mxu0 }
 0x272   : > { %1744 = vmatmul.bf16.gmra.mxu1 %v3988_v18  ;;  %v1892_v25 = vmax.f32 %v1550_v55, 0.0 }
 0x273   : > { %1842 = vmatmul.bf16.gmra.mxu3 %v3988_v18  ;;  %v4161_v33 = vpack.c.bf16 %v1889_v62, %v1885_v9  ;;  %v1601_v18 = vadd.f32 %v4084_v0, %v4076_v22  ;;  %v1604_v0 = vadd.f32 %v4119_v12, %v4058_v54  ;;  %v1516_v54 = vadd.f32 %v1515_v6, %v4032_v17 }
 0x276   : > { %v1647_v51 = vpop.f32.mrf.mxu3 }
 0x277   : > { %v1648_v60 = vadd.f32 %v1647_v51, %v1599_v59  ;;  %v1551_v29 = vpop.f32.mrf.mxu1  ;;  %v1618_v9 = vpop.f32.mrf.mxu2 }
 0x278   : > { %v1552_v36 = vadd.f32 %v1551_v29, %v1503_v32 }
 0x279   : > { %v1893_v46 = vmax.f32 %v1648_v60, 0.0 }
 0x27a   : > { %v1896_v40 = vmax.f32 %v1552_v36, 0.0 }
 0x27c   : > { %v4171_v20 = vpack.c.bf16 %v1896_v40, %v1892_v25 }
 0x27e   : > { %v1649_v61 = vpop.f32.mrf.mxu3 }
 0x27f   : > { %v1650_v15 = vadd.f32 %v1649_v61, %v1601_v18  ;;  %v1554_v31 = vpop.f32.mrf.mxu1  ;;  %v1620_v51 = vpop.f32.mrf.mxu2 }
 0x280   : > { %v4175_v19 = vadd.f32 %v1554_v31, %v1506_v63  ;;  %v1621_v6 = vadd.f32 %v1620_v51, %v4072_v1 }
 0x281   : > { %v1897_v27 = vmax.f32 %v1650_v15, 0.0  ;;  %v1521_v15 = vadd.f32 %v1520_v47, %v4028_v7 }
 0x282   : > { %1749 = vmatmul.bf16.gmra.mxu1 %v4004_v23 }
 0x283   : > { %1847 = vmatmul.bf16.gmra.mxu3 %v4004_v23  ;;  %v4179_v45 = vpack.c.bf16 %v1897_v27, %v1893_v46  ;;  %v1522_v23 = vpop.f32.mrf.mxu0 }
 0x284   : > { %v1523_v46 = vadd.f32 %v1522_v23, %v4072_v1  ;;  %v1616_v23 = vadd.f32 %v1615_v42, %v4044_v50 }
 0x286   : > { %v1652_v35 = vpop.f32.mrf.mxu3 }
 0x287   : > { %v4183_v34 = vadd.f32 %v1652_v35, %v1604_v0  ;;  %v1556_v14 = vpop.f32.mrf.mxu1  ;;  %v1779_v29 = vpop.f32.mrf.mxu2 }
 0x28b   : > { %v1681_v12 = vpop.f32.mrf.mxu0 }
 0x28e   : > { %v4185_v4 = vpop.f32.mrf.mxu3 }
 0x28f   : > { %v1559_v62 = vpop.f32.mrf.mxu1  ;;  %v4195_v18 = vpop.f32.mrf.mxu2 }
 0x292   : > { %1754 = vmatmul.bf16.gmra.mxu1 %v4024_v11 }
 0x293   : > { %1852 = vmatmul.bf16.gmra.mxu3 %v4024_v11  ;;  %v4193_v25 = vpop.f32.mrf.mxu0 }
 0x296   : > { %v4189_v55 = vpop.f32.mrf.mxu3 }
 0x297   : > { %v1561_v59 = vpop.f32.mrf.mxu1  ;;  %v4204_v0 = vpop.f32.mrf.mxu2 }
 0x29b   : > { %v4197_v63 = vpop.f32.mrf.mxu0 }
 0x29e   : > { %v1659_v32 = vpop.f32.mrf.mxu3 }
 0x29f   : > { %v1564_v60 = vpop.f32.mrf.mxu1 }
 0x2a0   : > { %v1565_v21 = vadd.f32 %v1564_v60, %v1516_v54  ;;  %v1614_v54 = vadd.f32 %v4167_v37, %v4032_v17  ;;  %v1609_v37 = vadd.f32 %v4147_v43, %v4088_v52  ;;  %v1684_v43 = vadd.f32 %v4193_v25, %v4101_v26 }
 0x2a2   : > { %1759 = vmatmul.bf16.gmra.mxu1 %v4048_v24  ;;  %v1916_v60 = vmax.f32 %v1565_v21, 0.0 }
 0x2a3   : > { %1857 = vmatmul.bf16.gmra.mxu3 %v4048_v24  ;;  %v1518_v24 = vadd.f32 %v1517_v30, %v4044_v50  ;;  %v1511_v30 = vadd.f32 %v4137_v57, %v4088_v52 }
 0x2a5   : > { %v1560_v57 = vadd.f32 %v1559_v62, %v1511_v30  ;;  %v1658_v30 = vadd.f32 %v4189_v55, %v1609_v37 }
 0x2a6   : > { %v1662_v36 = vpop.f32.mrf.mxu3 }
 0x2a7   : > { %v1566_v40 = vpop.f32.mrf.mxu1  ;;  %v1908_v21 = vmax.f32 %v1560_v57, 0.0 }
 0x2a8   : > { %v1567_v22 = vadd.f32 %v1566_v40, %v1518_v24 }
 0x2aa   : > { %v1920_v40 = vmax.f32 %v1567_v22, 0.0  ;;  %v1557_v22 = vadd.f32 %v1556_v14, %v1508_v41  ;;  %v1780_v14 = vadd.f32 %v1779_v29, %v4092_v44  ;;  %v1909_v29 = vmax.f32 %v1658_v30, 0.0 }
 0x2ae   : > { %v1664_v11 = vpop.f32.mrf.mxu3 }
 0x2af   : > { %v1569_v61 = vpop.f32.mrf.mxu1  ;;  %v1665_v42 = vadd.f32 %v1664_v11, %v1616_v23 }
 0x2b0   : > { %v1570_v27 = vadd.f32 %v1569_v61, %v1521_v15  ;;  %v4213_v61 = vpop.f32.mrf.mxu0  ;;  %v1562_v15 = vadd.f32 %v1561_v59, %v1513_v53  ;;  %v1611_v53 = vadd.f32 %v4157_v16, %v4046_v38  ;;  %v1606_v16 = vadd.f32 %v4133_v8, %v4095_v13 }
 0x2b1   : > { %v1921_v11 = vmax.f32 %v1665_v42, 0.0 }
 0x2b2   : > { %1764 = vmatmul.bf16.gmra.mxu1 %v4074_v3  ;;  %v1924_v47 = vmax.f32 %v1570_v27, 0.0  ;;  %v1912_v59 = vmax.f32 %v1562_v15, 0.0  ;;  %v1660_v62 = vadd.f32 %v1659_v32, %v1611_v53  ;;  %v1900_v32 = vmax.f32 %v4175_v19, 0.0 }
 0x2b3   : > { %1862 = vmatmul.bf16.gmra.mxu3 %v4074_v3  ;;  %v1619_v3 = vadd.f32 %v1618_v9, %v4028_v7  ;;  %v1782_v19 = vadd.f32 %v4195_v18, %v4101_v26  ;;  %v1687_v53 = vadd.f32 %v4197_v63, %v4090_v48 }
 0x2b4   : > { %v1952_v15 = vpack.c.bf16 %v1912_v59, %v1908_v21 }
 0x2b6   : > { %v1667_v31 = vpop.f32.mrf.mxu3 }
 0x2b7   : > { %v1571_v35 = vpop.f32.mrf.mxu1  ;;  %v1668_v24 = vadd.f32 %v1667_v31, %v1619_v3  ;;  %v1956_v3 = vpack.c.bf16 %v1920_v40, %v1916_v60 }
 0x2b8   : > { %v1572_v58 = vadd.f32 %v1571_v35, %v1523_v46 }
 0x2b9   : > { %v1925_v31 = vmax.f32 %v1668_v24, 0.0  ;;  %v1655_v24 = vadd.f32 %v4185_v4, %v1606_v16  ;;  %v1901_v4 = vmax.f32 %v4183_v34, 0.0  ;;  %v1785_v34 = vadd.f32 %v4204_v0, %v4090_v48 }
 0x2ba   : > { %v1928_v49 = vmax.f32 %v1572_v58, 0.0  ;;  %v1682_v58 = vadd.f32 %v1681_v12, %v4092_v44  ;;  %v4225_v12 = vpop.f32.mrf.mxu2 }
 0x2bb   : > { %v1787_v0 = vadd.f32 %v4225_v12, %v4123_v2 }
 0x2bc   : > { %v1960_v46 = vpack.c.bf16 %v1928_v49, %v1924_v47  ;;  %v1663_v49 = vadd.f32 %v1662_v36, %v1614_v54  ;;  %v1904_v36 = vmax.f32 %v1557_v22, 0.0 }
 0x2be   : > { %v1669_v9 = vpop.f32.mrf.mxu3  ;;  %2044 = vmatpush.bf16.msrb.mxu0 %v1960_v46  ;;  %v1917_v23 = vmax.f32 %v1663_v49, 0.0  ;;  %v1913_v46 = vmax.f32 %v1660_v62, 0.0  ;;  %v1948_v55 = vpack.c.bf16 %v1904_v36, %v1900_v32 }
 0x2bf   : > { %v1670_v27 = vadd.f32 %v1669_v9, %v1621_v6  ;;  %v1730_v51 = vpop.f32.mrf.mxu1  ;;  %v1691_v6 = vpop.f32.mrf.mxu0 }
 0x2c0   : > { %v1731_v35 = vadd.f32 %v1730_v51, %v1682_v58  ;;  %v1957_v8 = vpack.c.bf16 %v1921_v11, %v1917_v23  ;;  %v1905_v58 = vmax.f32 %v1655_v24, 0.0  ;;  %v1953_v25 = vpack.c.bf16 %v1913_v46, %v1909_v29 }
 0x2c1   : > { %v1929_v28 = vmax.f32 %v1670_v27, 0.0 }
 0x2c2   : > { %2045 = vmatpush.bf16.msrb.mxu0 %v1956_v3  ;;  %v1870_v9 = vmax.f32 %v1731_v35, 0.0  ;;  %v1789_v60 = vpop.f32.mrf.mxu2  ;;  %v1949_v59 = vpack.c.bf16 %v1905_v58, %v1901_v4 }
 0x2c3   : > { %v1961_v47 = vpack.c.bf16 %v1929_v28, %v1925_v31 }
 0x2c5   : > { %2073 = vmatpush.bf16.msrb.mxu1 %v1961_v47 }
 0x2c6   : > { %v1828_v40 = vpop.f32.mrf.mxu3  ;;  %2046 = vmatpush.bf16.msrb.mxu0 %v1952_v15  ;;  %v4687_v15 = vld [vmem:[#allocation12_spill] sm:$0xff] }
 0x2c7   : > { %v1829_v41 = vadd.f32 %v1828_v40, %v1780_v14  ;;  %v1732_v44 = vpop.f32.mrf.mxu1  ;;  %v1693_v49 = vpop.f32.mrf.mxu0 }
 0x2c8   : > { %v1733_v54 = vadd.f32 %v1732_v44, %v1684_v43  ;;  %v4688_v43 = vld [vmem:[#allocation11_spill] sm:$0xff] }
 0x2c9   : > { %2074 = vmatpush.bf16.msrb.mxu1 %v1957_v8  ;;  %v1871_v31 = vmax.f32 %v1829_v41, 0.0  ;;  %v1694_v32 = vadd.f32 %v1693_v49, %v4688_v43  ;;  %v4275_v41 = vld [vmem:[%s4542_s5 + $0x8] sm:$0xff] }
 0x2ca   : > { %v1874_v57 = vmax.f32 %v1733_v54, 0.0  ;;  %2047 = vmatpush.bf16.msrb.mxu0 %v1948_v55  ;;  %v1791_v18 = vpop.f32.mrf.mxu2 }
 0x2cb   : > { %v1792_v29 = vadd.f32 %v1791_v18, %v4688_v43 }
 0x2cc   : > { %v4238_v42 = vpack.c.bf16 %v1874_v57, %v1870_v9  ;;  %v4689_v9 = vld [vmem:[#allocation9_spill] sm:$0xff] }
 0x2cd   : > { %2075 = vmatpush.bf16.msrb.mxu1 %v1953_v25 }
 0x2ce   : > { %v1830_v27 = vpop.f32.mrf.mxu3  ;;  %2048 = vmatpush.bf16.msrb.mxu0 %v4171_v20  ;;  %v1689_v20 = vadd.f32 %v4213_v61, %v4123_v2 }
 0x2cf   : > { %v1831_v22 = vadd.f32 %v1830_v27, %v1782_v19  ;;  %v1735_v51 = vpop.f32.mrf.mxu1  ;;  %v1696_v62 = vpop.f32.mrf.mxu0 }
 0x2d0   : > { %v1736_v35 = vadd.f32 %v1735_v51, %v1687_v53  ;;  %v1697_v57 = vadd.f32 %v1696_v62, %v4689_v9  ;;  %v4690_v51 = vld [vmem:[#allocation8_spill] sm:$0xff] }
 0x2d1   : > { %v1875_v28 = vmax.f32 %v1831_v22, 0.0  ;;  %2076 = vmatpush.bf16.msrb.mxu1 %v1949_v59 }
 0x2d2   : > { %2049 = vmatpush.bf16.msrb.mxu0 %v4153_v39  ;;  %v4256_v39 = vld [vmem:[%s4542_s5] sm:$0xff]  ;;  %v1878_v48 = vmax.f32 %v1736_v35, 0.0  ;;  %v1794_v16 = vpop.f32.mrf.mxu2 }
 0x2d3   : > { %v4243_v26 = vpack.c.bf16 %v1875_v28, %v1871_v31  ;;  %v1795_v59 = vadd.f32 %v1794_v16, %v4689_v9 }
 0x2d5   : > { %2077 = vmatpush.bf16.msrb.mxu1 %v4179_v45 }
 0x2d6   : > { %v1833_v63 = vpop.f32.mrf.mxu3  ;;  %2050 = vmatpush.bf16.msrb.mxu0 %v4131_v56 }
 0x2d7   : > { %v1834_v3 = vadd.f32 %v1833_v63, %v1785_v34  ;;  %v1737_v37 = vpop.f32.mrf.mxu1  ;;  %v1698_v2 = vpop.f32.mrf.mxu0  ;;  %v4292_v63 = vld [vmem:[%s4542_s5 + $0x10] sm:$0xff] }
 0x2d8   : > { %v1738_v21 = vadd.f32 %v1737_v37, %v1689_v20  ;;  %v1699_v31 = vadd.f32 %v1698_v2, %v4690_v51 }
 0x2d9   : > { %2078 = vmatpush.bf16.msrb.mxu1 %v4161_v33  ;;  %v4686_v33 = vld [vmem:[#allocation7_spill] sm:$0xff]  ;;  %v1879_v36 = vmax.f32 %v1834_v3, 0.0 }
 0x2da   : > { %v1882_v45 = vmax.f32 %v1738_v21, 0.0  ;;  %2051 = vmatpush.bf16.msrb.mxu0 %v4109_v10  ;;  %v1692_v11 = vadd.f32 %v1691_v6, %v4686_v33  ;;  %v1796_v46 = vpop.f32.mrf.mxu2 }
 0x2db   : > { %v1797_v37 = vadd.f32 %v1796_v46, %v4690_v51 }
 0x2dc   : > { %v4261_v61 = vpack.c.bf16 %v1882_v45, %v1878_v48  ;;  %v4691_v45 = vld [vmem:[#allocation6_spill] sm:$0xff] }
 0x2dd   : > { %2079 = vmatpush.bf16.msrb.mxu1 %v4141_v5  ;;  %2052 = vmatmul.bf16.vlgmr.msrb.gmra.mxu0 %v4256_v39  ;;  %v1790_v5 = vadd.f32 %v1789_v60, %v4686_v33 }
 0x2de   : > { %v1835_v56 = vpop.f32.mrf.mxu3 }
 0x2df   : > { %v1836_v47 = vadd.f32 %v1835_v56, %v1787_v0  ;;  %v1740_v14 = vpop.f32.mrf.mxu1  ;;  %v1701_v55 = vpop.f32.mrf.mxu0 }
 0x2e0   : > { %v1741_v23 = vadd.f32 %v1740_v14, %v1692_v11  ;;  %v1702_v0 = vadd.f32 %v1701_v55, %v4691_v45 }
 0x2e1   : > { %v1883_v30 = vmax.f32 %v1836_v47, 0.0  ;;  %2080 = vmatpush.bf16.msrb.mxu1 %v4687_v15 }
 0x2e2   : > { %v1886_v8 = vmax.f32 %v1741_v23, 0.0  ;;  %v1799_v22 = vpop.f32.mrf.mxu2 }
 0x2e3   : > { %v4267_v10 = vpack.c.bf16 %v1883_v30, %v1879_v36  ;;  %v1800_v30 = vadd.f32 %v1799_v22, %v4691_v45 }
 0x2e4   : > { %2081 = vmatmul.bf16.vlgmr.msrb.gmra.mxu1 %v4256_v39 }
 0x2e6   : > { %v1838_v12 = vpop.f32.mrf.mxu3 }
 0x2e7   : > { %v1839_v40 = vadd.f32 %v1838_v12, %v1790_v5  ;;  %v1742_v6 = vpop.f32.mrf.mxu1  ;;  %v4287_v35 = vpop.f32.mrf.mxu0  ;;  %v4312_v12 = vld [vmem:[%s4542_s5 + $0x18] sm:$0xff] }
 0x2e8   : > { %v1743_v24 = vadd.f32 %v1742_v6, %v1694_v32 }
 0x2e9   : > { %v1887_v19 = vmax.f32 %v1839_v40, 0.0 }
 0x2ea   : > { %v1890_v44 = vmax.f32 %v1743_v24, 0.0  ;;  %v4297_v62 = vpop.f32.mrf.mxu2 }
 0x2ec   : > { %v4278_v54 = vpack.c.bf16 %v1890_v44, %v1886_v8 }
 0x2ed   : > { %2057 = vmatmul.bf16.gmra.mxu0 %v4275_v41 }
 0x2ee   : > { %v1840_v58 = vpop.f32.mrf.mxu3 }
 0x2ef   : > { %v1841_v25 = vadd.f32 %v1840_v58, %v1792_v29  ;;  %v1745_v60 = vpop.f32.mrf.mxu1  ;;  %v1706_v14 = vpop.f32.mrf.mxu0 }
 0x2f0   : > { %v1746_v27 = vadd.f32 %v1745_v60, %v1697_v57 }
 0x2f1   : > { %v1891_v4 = vmax.f32 %v1841_v25, 0.0 }
 0x2f2   : > { %v1894_v20 = vmax.f32 %v1746_v27, 0.0  ;;  %v1804_v2 = vpop.f32.mrf.mxu2 }
 0x2f3   : > { %v4282_v53 = vpack.c.bf16 %v1891_v4, %v1887_v19 }
 0x2f4   : > { %2086 = vmatmul.bf16.gmra.mxu1 %v4275_v41 }
 0x2f6   : > { %v1843_v49 = vpop.f32.mrf.mxu3 }
 0x2f7   : > { %v1844_v28 = vadd.f32 %v1843_v49, %v1795_v59  ;;  %v1747_v34 = vpop.f32.mrf.mxu1  ;;  %v1708_v43 = vpop.f32.mrf.mxu0 }
 0x2f8   : > { %v1748_v18 = vadd.f32 %v1747_v34, %v1699_v31 }
 0x2f9   : > { %v1895_v11 = vmax.f32 %v1844_v28, 0.0 }
 0x2fa   : > { %v1898_v3 = vmax.f32 %v1748_v18, 0.0  ;;  %v1806_v6 = vpop.f32.mrf.mxu2 }
 0x2fc   : > { %v4295_v21 = vpack.c.bf16 %v1898_v3, %v1894_v20 }
 0x2fd   : > { %2062 = vmatmul.bf16.gmra.mxu0 %v4292_v63 }
 0x2fe   : > { %v1845_v48 = vpop.f32.mrf.mxu3 }
 0x2ff   : > { %v1846_v56 = vadd.f32 %v1845_v48, %v1797_v37  ;;  %v1750_v33 = vpop.f32.mrf.mxu1  ;;  %v1711_v24 = vpop.f32.mrf.mxu0  ;;  %v1709_v37 = vadd.f32 %v1708_v43, %v4046_v38 }
 0x300   : > { %v4301_v16 = vadd.f32 %v1750_v33, %v1702_v0  ;;  %v1712_v18 = vadd.f32 %v1711_v24, %v4032_v17 }
 0x301   : > { %v1899_v47 = vmax.f32 %v1846_v56, 0.0 }
 0x302   : > { %v1809_v44 = vpop.f32.mrf.mxu2 }
 0x303   : > { %v4303_v36 = vpack.c.bf16 %v1899_v47, %v1895_v11  ;;  %v1707_v11 = vadd.f32 %v1706_v14, %v4088_v52  ;;  %v1810_v43 = vadd.f32 %v1809_v44, %v4032_v17  ;;  %v1807_v14 = vadd.f32 %v1806_v6, %v4046_v38 }
 0x304   : > { %2091 = vmatmul.bf16.gmra.mxu1 %v4292_v63 }
 0x306   : > { %v1848_v23 = vpop.f32.mrf.mxu3 }
 0x307   : > { %v4307_v15 = vadd.f32 %v1848_v23, %v1800_v30  ;;  %v1752_v5 = vpop.f32.mrf.mxu1  ;;  %v1713_v55 = vpop.f32.mrf.mxu0 }
 0x308   : > { %v1714_v51 = vadd.f32 %v1713_v55, %v4044_v50 }
 0x30a   : > { %v1811_v9 = vpop.f32.mrf.mxu2 }
 0x30b   : > { %v1812_v47 = vadd.f32 %v1811_v9, %v4044_v50 }
 0x30d   : > { %2067 = vmatmul.bf16.gmra.mxu0 %v4312_v12 }
 0x30e   : > { %v4314_v32 = vpop.f32.mrf.mxu3 }
 0x30f   : > { %v1755_v40 = vpop.f32.mrf.mxu1  ;;  %v1716_v60 = vpop.f32.mrf.mxu0 }
 0x310   : > { %v1717_v59 = vadd.f32 %v1716_v60, %v4028_v7 }
 0x312   : > { %v1814_v4 = vpop.f32.mrf.mxu2 }
 0x313   : > { %v1815_v45 = vadd.f32 %v1814_v4, %v4028_v7  ;;  %v1756_v7 = vadd.f32 %v1755_v40, %v1707_v11  ;;  %v1802_v40 = vadd.f32 %v4297_v62, %v4095_v13 }
 0x314   : > { %2096 = vmatmul.bf16.gmra.mxu1 %v4312_v12 }
 0x315   : > { %v1851_v6 = vadd.f32 %v4314_v32, %v1802_v40 }
 0x316   : > { %v1853_v46 = vpop.f32.mrf.mxu3 }
 0x317   : > { %v1757_v8 = vpop.f32.mrf.mxu1  ;;  %v1718_v22 = vpop.f32.mrf.mxu0 }
 0x318   : > { %v1719_v31 = vadd.f32 %v1718_v22, %v4072_v1  ;;  %v1758_v30 = vadd.f32 %v1757_v8, %v1709_v37 }
 0x31a   : > { %v1816_v48 = vpop.f32.mrf.mxu2  ;;  %v1914_v8 = vmax.f32 %v1758_v30, 0.0 }
 0x31b   : > { %v1817_v23 = vadd.f32 %v1816_v48, %v4072_v1 }
 0x31e   : > { %v1855_v29 = vpop.f32.mrf.mxu3 }
 0x31f   : > { %v1760_v58 = vpop.f32.mrf.mxu1 }
 0x320   : > { %v1761_v0 = vadd.f32 %v1760_v58, %v1712_v18 }
 0x322   : > { %v1918_v58 = vmax.f32 %v1761_v0, 0.0 }
 0x326   : > { %v1858_v57 = vpop.f32.mrf.mxu3 }
 0x327   : > { %v1762_v25 = vpop.f32.mrf.mxu1  ;;  %v1859_v9 = vadd.f32 %v1858_v57, %v1810_v43 }
 0x328   : > { %v1763_v20 = vadd.f32 %v1762_v25, %v1714_v51  ;;  %v1704_v25 = vadd.f32 %v4287_v35, %v4095_v13  ;;  %v1805_v51 = vadd.f32 %v1804_v2, %v4088_v52  ;;  %v1856_v35 = vadd.f32 %v1855_v29, %v1807_v14 }
 0x329   : > { %v1919_v38 = vmax.f32 %v1859_v9, 0.0  ;;  %v1907_v29 = vmax.f32 %v1851_v6, 0.0  ;;  %v1903_v13 = vmax.f32 %v4307_v15, 0.0 }
 0x32a   : > { %v1922_v55 = vmax.f32 %v1763_v20, 0.0  ;;  %v1753_v50 = vadd.f32 %v1752_v5, %v1704_v25  ;;  %v1902_v5 = vmax.f32 %v4301_v16, 0.0  ;;  %v1915_v57 = vmax.f32 %v1856_v35, 0.0  ;;  %v4355_v16 = vpop.permute.xlu1 %1987 }
 0x32b   : > { %v1951_v62 = vpack.c.bf16 %v1907_v29, %v1903_v13 }
 0x32c   : > { %v1958_v1 = vpack.c.bf16 %v1922_v55, %v1918_v58  ;;  %v1906_v44 = vmax.f32 %v1753_v50, 0.0 }
 0x32e   : > { %v1860_v19 = vpop.f32.mrf.mxu3  ;;  %v1950_v52 = vpack.c.bf16 %v1906_v44, %v1902_v5 }
 0x32f   : > { %v1765_v27 = vpop.f32.mrf.mxu1  ;;  %v1861_v4 = vadd.f32 %v1860_v19, %v1812_v47  ;;  %v1854_v19 = vadd.f32 %v1853_v46, %v1805_v51 }
 0x330   : > { %v1766_v28 = vadd.f32 %v1765_v27, %v1717_v59 }
 0x331   : > { %v1911_v2 = vmax.f32 %v1854_v19, 0.0 }
 0x332   : > { %v1926_v56 = vmax.f32 %v1766_v28, 0.0  ;;  %v1923_v28 = vmax.f32 %v1861_v4, 0.0  ;;  %v4361_v32 = vpop.permute.xlu1 %2202 }
 0x333   : > { %v1955_v20 = vpack.c.bf16 %v1915_v57, %v1911_v2 }
 0x334   : > { %v1959_v18 = vpack.c.bf16 %v1923_v28, %v1919_v38 }
 0x336   : > { %v1863_v49 = vpop.f32.mrf.mxu3 }
 0x337   : > { %v1767_v34 = vpop.f32.mrf.mxu1  ;;  %v1864_v60 = vadd.f32 %v1863_v49, %v1815_v45 }
 0x338   : > { %v1768_v3 = vadd.f32 %v1767_v34, %v1719_v31  ;;  %v1910_v31 = vmax.f32 %v1756_v7, 0.0 }
 0x339   : > { %v1927_v59 = vmax.f32 %v1864_v60, 0.0 }
 0x33a   : > { %v1930_v33 = vmax.f32 %v1768_v3, 0.0  ;;  %v1954_v34 = vpack.c.bf16 %v1914_v8, %v1910_v31  ;;  %v4369_v45 = vpop.permute.xlu1 %2212 }
 0x33c   : > { %v1962_v24 = vpack.c.bf16 %v1930_v33, %v1926_v56 }
 0x33e   : > { %v1865_v27 = vpop.f32.mrf.mxu3  ;;  %2102 = vmatpush.bf16.msrb.mxu2 %v1962_v24 }
 0x33f   : > { %v1866_v22 = vadd.f32 %v1865_v27, %v1817_v23 }
 0x341   : > { %v1931_v49 = vmax.f32 %v1866_v22, 0.0 }
 0x342   : > { %2103 = vmatpush.bf16.msrb.mxu2 %v1958_v1  ;;  %v4383_v43 = vpop.permute.xlu1 %2012 }
 0x343   : > { %v1963_v17 = vpack.c.bf16 %v1931_v49, %v1927_v59 }
 0x345   : > { %2131 = vmatpush.bf16.msrb.mxu3 %v1963_v17 }
 0x346   : > { %2104 = vmatpush.bf16.msrb.mxu2 %v1954_v34 }
 0x349   : > { %2132 = vmatpush.bf16.msrb.mxu3 %v1959_v18 }
 0x34a   : > { %2105 = vmatpush.bf16.msrb.mxu2 %v1950_v52 }
 0x34d   : > { %2133 = vmatpush.bf16.msrb.mxu3 %v1955_v20 }
 0x34e   : > { %2106 = vmatpush.bf16.msrb.mxu2 %v4295_v21  ;;  %v4353_v21 = vpop.permute.xlu0 %1982 }
 0x351   : > { %2134 = vmatpush.bf16.msrb.mxu3 %v1951_v62 }
 0x352   : > { %2107 = vmatpush.bf16.msrb.mxu2 %v4278_v54 }
 0x355   : > { %2135 = vmatpush.bf16.msrb.mxu3 %v4303_v36  ;;  %v4357_v36 = vpop.permute.xlu2 %1992 }
 0x356   : > { %2108 = vmatpush.bf16.msrb.mxu2 %v4261_v61  ;;  %v4359_v15 = vpop.permute.xlu0 %1997 }
 0x359   : > { %2136 = vmatpush.bf16.msrb.mxu3 %v4282_v53 }
 0x35a   : > { %2109 = vmatpush.bf16.msrb.mxu2 %v4238_v42  ;;  %v2053_v61 = vpop.f32.mrf.mxu0 }
 0x35b   : > { %v2054_v50 = vadd.f32 %v2053_v61, %v4353_v21 }
 0x35d   : > { %2137 = vmatpush.bf16.msrb.mxu3 %v4267_v10  ;;  %2110 = vmatmul.bf16.vlgmr.msrb.gmra.mxu2 %v4256_v39  ;;  %v4363_v46 = vpop.permute.xlu2 %2207  ;;  %v2160_v38 = vmax.f32 %v2054_v50, 0.0 }
 0x35e   : > { %v4365_v3 = vpop.permute.xlu0 %2002 }
 0x361   : > { %2138 = vmatpush.bf16.msrb.mxu3 %v4243_v26  ;;  %v2082_v42 = vpop.f32.mrf.mxu1 }
 0x362   : > { %v2055_v54 = vpop.f32.mrf.mxu0  ;;  %v2083_v23 = vadd.f32 %v2082_v42, %v4353_v21 }
 0x363   : > { %v2056_v27 = vadd.f32 %v2055_v54, %v4355_v16  ;;  %v2240_v54 = vmul.f32 %v4361_v32, %v2160_v38 }
 0x364   : > { %2139 = vmatmul.bf16.vlgmr.msrb.gmra.mxu3 %v4256_v39  ;;  %v2161_v58 = vmax.f32 %v2083_v23, 0.0 }
 0x365   : > { %v4371_v56 = vpop.permute.xlu2 %2007  ;;  %v2164_v31 = vmax.f32 %v2056_v27, 0.0 }
 0x366   : > { %v4373_v33 = vpop.permute.xlu0 %2217  ;;  %v2241_v17 = vmul.f32 %v4361_v32, %v2161_v58 }
 0x367   : > { %v2244_v29 = vmul.f32 %v4363_v46, %v2164_v31 }
 0x369   : > { %v2084_v10 = vpop.f32.mrf.mxu1  ;;  %v2272_v23 = vadd.f32 %v2244_v29, %v2240_v54 }
 0x36a   : > { %v2058_v26 = vpop.f32.mrf.mxu0  ;;  %v2085_v47 = vadd.f32 %v2084_v10, %v4355_v16  ;;  %v4407_v10 = vpop.permute.xlu1 %2227 }
 0x36b   : > { %v2059_v8 = vadd.f32 %v2058_v26, %v4357_v36 }
 0x36c   : > { %v2165_v24 = vmax.f32 %v2085_v47, 0.0 }
 0x36d   : > { %2115 = vmatmul.bf16.gmra.mxu2 %v4275_v41  ;;  %v4387_v14 = vpop.permute.xlu2 %2222  ;;  %v2168_v5 = vmax.f32 %v2059_v8, 0.0 }
 0x36e   : > { %v2245_v9 = vmul.f32 %v4363_v46, %v2165_v24  ;;  %v4395_v51 = vpop.permute.xlu0 %2017 }
 0x370   : > { %v2285_v57 = vadd.f32 %v2245_v9, %v2241_v17 }
 0x371   : > { %v2087_v53 = vpop.f32.mrf.mxu1 }
 0x372   : > { %v2088_v55 = vadd.f32 %v2087_v53, %v4357_v36  ;;  %v2248_v53 = vmul.f32 %v4369_v45, %v2168_v5 }
 0x374   : > { %2144 = vmatmul.bf16.gmra.mxu3 %v4275_v41  ;;  %v2060_v41 = vpop.f32.mrf.mxu0  ;;  %v2169_v4 = vmax.f32 %v2088_v55, 0.0 }
 0x375   : > { %v2061_v35 = vadd.f32 %v2060_v41, %v4359_v15  ;;  %v4413_v47 = vpop.permute.xlu2 %2232 }
 0x376   : > { %v2249_v40 = vmul.f32 %v4369_v45, %v2169_v4  ;;  %v4418_v4 = vpop.permute.xlu0 %2237 }
 0x377   : > { %v2172_v20 = vmax.f32 %v2061_v35, 0.0 }
 0x378   : > { %v2286_v13 = vadd.f32 %v2285_v57, %v2249_v40 }
 0x379   : > { %v2089_v39 = vpop.f32.mrf.mxu1 }
 0x37a   : > { %v2090_v25 = vadd.f32 %v2089_v39, %v4359_v15 }
 0x37c   : > { %v2173_v1 = vmax.f32 %v2090_v25, 0.0 }
 0x37d   : > { %2120 = vmatmul.bf16.gmra.mxu2 %v4292_v63 }
 0x37e   : > { %v2253_v18 = vmul.f32 %v4373_v33, %v2173_v1 }
 0x380   : > { %v2287_v41 = vadd.f32 %v2286_v13, %v2253_v18 }
 0x384   : > { %2149 = vmatmul.bf16.gmra.mxu3 %v4292_v63  ;;  %v2092_v63 = vpop.f32.mrf.mxu1 }
 0x385   : > { %v2093_v22 = vadd.f32 %v2092_v63, %v4365_v3 }
 0x387   : > { %v2177_v44 = vmax.f32 %v2093_v22, 0.0  ;;  %v2273_v22 = vadd.f32 %v2272_v23, %v2248_v53 }
 0x389   : > { %v2257_v62 = vmul.f32 %v4387_v14, %v2177_v44 }
 0x38b   : > { %v2288_v55 = vadd.f32 %v2287_v41, %v2257_v62 }
 0x38c   : > { %v2094_v37 = vpop.f32.mrf.mxu1 }
 0x38d   : > { %2125 = vmatmul.bf16.gmra.mxu2 %v4312_v12  ;;  %v2095_v59 = vadd.f32 %v2094_v37, %v4371_v56 }
 0x38f   : > { %v2181_v52 = vmax.f32 %v2095_v59, 0.0 }
 0x391   : > { %v2261_v63 = vmul.f32 %v4407_v10, %v2181_v52 }
 0x394   : > { %2154 = vmatmul.bf16.gmra.mxu3 %v4312_v12  ;;  %v2063_v12 = vpop.f32.mrf.mxu0  ;;  %v2097_v11 = vpop.f32.mrf.mxu1 }
 0x395   : > { %v2098_v19 = vadd.f32 %v2097_v11, %v4383_v43  ;;  %v2064_v6 = vadd.f32 %v2063_v12, %v4365_v3 }
 0x397   : > { %v2185_v61 = vmax.f32 %v2098_v19, 0.0  ;;  %v2176_v26 = vmax.f32 %v2064_v6, 0.0 }
 0x399   : > { %v2265_v25 = vmul.f32 %v4413_v47, %v2185_v61  ;;  %v2256_v50 = vmul.f32 %v4387_v14, %v2176_v26 }
 0x39c   : > { %v2065_v0 = vpop.f32.mrf.mxu0  ;;  %v2099_v28 = vpop.f32.mrf.mxu1 }
 0x39d   : > { %v2100_v2 = vadd.f32 %v2099_v28, %v4395_v51  ;;  %v2066_v42 = vadd.f32 %v2065_v0, %v4371_v56  ;;  %v2252_v0 = vmul.f32 %v4373_v33, %v2172_v20 }
 0x39f   : > { %v2189_v37 = vmax.f32 %v2100_v2, 0.0  ;;  %v2180_v24 = vmax.f32 %v2066_v42, 0.0  ;;  %v2274_v1 = vadd.f32 %v2273_v22, %v2252_v0 }
 0x3a1   : > { %v2269_v9 = vmul.f32 %v4418_v4, %v2189_v37  ;;  %v2260_v59 = vmul.f32 %v4407_v10, %v2180_v24  ;;  %v2275_v28 = vadd.f32 %v2274_v1, %v2256_v50 }
 0x3a3   : > { %v2276_v19 = vadd.f32 %v2275_v28, %v2260_v59 }
 0x3a4   : > { %v2068_v7 = vpop.f32.mrf.mxu0 }
 0x3a5   : > { %v2069_v12 = vadd.f32 %v2068_v7, %v4383_v43  ;;  %v2289_v7 = vadd.f32 %v2288_v55, %v2261_v63 }
 0x3a7   : > { %v2184_v8 = vmax.f32 %v2069_v12, 0.0  ;;  %v2290_v31 = vadd.f32 %v2289_v7, %v2265_v25 }
 0x3a9   : > { %v2264_v17 = vmul.f32 %v4413_v47, %v2184_v8  ;;  %v2291_v40 = vadd.f32 %v2290_v31, %v2269_v9  ;;  %v2328_v31 = vpop.permute.xlu1 %2327 }
 0x3ab   : > { %v2277_v6 = vadd.f32 %v2276_v19, %v2264_v17  ;;  %v2292_v57 = vrot.slane %v2291_v40, 4 }
 0x3ac   : > { %v2070_v39 = vpop.f32.mrf.mxu0 }
 0x3ad   : > { %v2071_v27 = vadd.f32 %v2070_v39, %v4395_v51  ;;  %v2293_v52 = vadd.f32 %v2292_v57, %v2291_v40 }
 0x3af   : > { %v2188_v35 = vmax.f32 %v2071_v27, 0.0  ;;  %v2294_v61 = vrot.slane %v2293_v52, 2 }
 0x3b1   : > { %v2268_v38 = vmul.f32 %v4418_v4, %v2188_v35 }
 0x3b3   : > { %v2278_v18 = vadd.f32 %v2277_v6, %v2268_v38 }
 0x3b5   : > { %v2279_v20 = vrot.slane %v2278_v18, 4 }
 0x3b7   : > { %v2280_v26 = vadd.f32 %v2279_v20, %v2278_v18  ;;  %v2330_v18 = vperm.slane %v2328_v31, 0 }
 0x3b9   : > { %v2281_v24 = vrot.slane %v2280_v26, 2 }
 0x3bb   : > { %v2282_v1 = vadd.f32 %v2281_v24, %v2280_v26 }
 0x3e0   : > { %v4367_v48 = vpop.f32.mrf.mxu2 }
 0x3e1   : > { %v2112_v62 = vadd.f32 %v4367_v48, %v4353_v21 }
 0x3e3   : > { %v2162_v41 = vmax.f32 %v2112_v62, 0.0 }
 0x3e5   : > { %v2242_v27 = vmul.f32 %v4361_v32, %v2162_v41 }
 0x3e7   : > { %v4376_v30 = vpop.f32.mrf.mxu3 }
 0x3e8   : > { %v4380_v60 = vpop.f32.mrf.mxu2  ;;  %v2141_v37 = vadd.f32 %v4376_v30, %v4353_v21 }
 0x3e9   : > { %v2114_v29 = vadd.f32 %v4380_v60, %v4355_v16  ;;  %v2295_v60 = vadd.f32 %v2294_v61, %v2293_v52  ;;  %v2283_v52 = vrot.slane %v2282_v1, 1 }
 0x3eb   : > { %v2166_v54 = vmax.f32 %v2114_v29, 0.0  ;;  %v2296_v30 = vrot.slane %v2295_v60, 1 }
 0x3ef   : > { %v4393_v49 = vpop.f32.mrf.mxu3 }
 0x3f0   : > { %v2116_v34 = vpop.f32.mrf.mxu2  ;;  %v2143_v39 = vadd.f32 %v4393_v49, %v4355_v16 }
 0x3f1   : > { %v2117_v42 = vadd.f32 %v2116_v34, %v4357_v36  ;;  %v2246_v34 = vmul.f32 %v4363_v46, %v2166_v54 }
 0x3f2   : > { %v2167_v25 = vmax.f32 %v2143_v39, 0.0 }
 0x3f3   : > { %v2170_v63 = vmax.f32 %v2117_v42, 0.0  ;;  %v2298_v50 = vadd.f32 %v2246_v34, %v2242_v27 }
 0x3f7   : > { %v2145_v11 = vpop.f32.mrf.mxu3 }
 0x3f8   : > { %v2118_v58 = vpop.f32.mrf.mxu2  ;;  %v2146_v48 = vadd.f32 %v2145_v11, %v4357_v36  ;;  %v2163_v36 = vmax.f32 %v2141_v37, 0.0 }
 0x3f9   : > { %v2119_v53 = vadd.f32 %v2118_v58, %v4359_v15  ;;  %v2250_v58 = vmul.f32 %v4369_v45, %v2170_v63 }
 0x3fa   : > { %v2171_v11 = vmax.f32 %v2146_v48, 0.0  ;;  %v2243_v19 = vmul.f32 %v4361_v32, %v2163_v36 }
 0x3fb   : > { %v2174_v0 = vmax.f32 %v2119_v53, 0.0  ;;  %v2299_v35 = vadd.f32 %v2298_v50, %v2250_v58 }
 0x3fc   : > { %v2251_v38 = vmul.f32 %v4369_v45, %v2171_v11 }
 0x3fd   : > { %v2254_v7 = vmul.f32 %v4373_v33, %v2174_v0 }
 0x3ff   : > { %v2147_v44 = vpop.f32.mrf.mxu3  ;;  %v2300_v6 = vadd.f32 %v2299_v35, %v2254_v7 }
 0x400   : > { %v2121_v5 = vpop.f32.mrf.mxu2  ;;  %v2148_v16 = vadd.f32 %v2147_v44, %v4359_v15  ;;  %v2247_v15 = vmul.f32 %v4363_v46, %v2167_v25  ;;  %v2297_v44 = vadd.f32 %v2296_v30, %v2295_v60 }
 0x401   : > { %v2122_v12 = vadd.f32 %v2121_v5, %v4365_v3 }
 0x402   : > { %v2175_v59 = vmax.f32 %v2148_v16, 0.0  ;;  %v2332_v45 = vadd.f32 %v2330_v18, %v2297_v44 }
 0x403   : > { %v2178_v22 = vmax.f32 %v2122_v12, 0.0 }
 0x404   : > { %v2255_v29 = vmul.f32 %v4373_v33, %v2175_v59  ;;  %v2753_v12 = vmul.f32 -1.442695, %v2332_v45 }
 0x405   : > { %v2258_v28 = vmul.f32 %v4387_v14, %v2178_v22 }
 0x406   : > { %2848 = vpow2.f32 %v2753_v12 }
 0x407   : > { %v2150_v2 = vpop.f32.mrf.mxu3 }
 0x408   : > { %v2123_v13 = vpop.f32.mrf.mxu2  ;;  %v2151_v8 = vadd.f32 %v2150_v2, %v4365_v3  ;;  %v2311_v2 = vadd.f32 %v2247_v15, %v2243_v19 }
 0x409   : > { %v2124_v55 = vadd.f32 %v2123_v13, %v4371_v56 }
 0x40a   : > { %v2179_v3 = vmax.f32 %v2151_v8, 0.0  ;;  %v2312_v42 = vadd.f32 %v2311_v2, %v2251_v38 }
 0x40b   : > { %v2182_v9 = vmax.f32 %v2124_v55, 0.0 }
 0x40c   : > { %v2259_v61 = vmul.f32 %v4387_v14, %v2179_v3  ;;  %v2313_v39 = vadd.f32 %v2312_v42, %v2255_v29  ;;  %v2849_v30 = vpop.eup %2848 }
 0x40d   : > { %v2262_v57 = vmul.f32 %v4407_v10, %v2182_v9  ;;  %v2348_v50 = vadd.f32 1.0, %v2849_v30 }
 0x40e   : > { %v2314_v37 = vadd.f32 %v2313_v39, %v2259_v61 }
 0x40f   : > { %v2152_v23 = vpop.f32.mrf.mxu3  ;;  %vm2371_vm2 = vweird.f32 %v2348_v50 }
 0x410   : > { %v2126_v49 = vpop.f32.mrf.mxu2  ;;  %v2153_v17 = vadd.f32 %v2152_v23, %v4371_v56  ;;  %v2301_v56 = vadd.f32 %v2300_v6, %v2258_v28 }
 0x411   : > { %v2127_v21 = vadd.f32 %v2126_v49, %v4383_v43 }
 0x412   : > { %v2183_v13 = vmax.f32 %v2153_v17, 0.0  ;;  %v2302_v54 = vadd.f32 %v2301_v56, %v2262_v57 }
 0x413   : > { %v2186_v40 = vmax.f32 %v2127_v21, 0.0 }
 0x414   : > { %v2263_v41 = vmul.f32 %v4407_v10, %v2183_v13 }
 0x415   : > { %v2266_v62 = vmul.f32 %v4413_v47, %v2186_v40 }
 0x416   : > { %v2315_v14 = vadd.f32 %v2314_v37, %v2263_v41 }
 0x417   : > { %v2155_v5 = vpop.f32.mrf.mxu3  ;;  %v2303_v63 = vadd.f32 %v2302_v54, %v2266_v62  ;;  %v2375_v62 = vand.u32 2147483647, %v2348_v50 }
 0x418   : > { %v2156_v46 = vadd.f32 %v2155_v5, %v4383_v43  ;;  %v2128_v20 = vpop.f32.mrf.mxu2  ;;  %v2284_v43 = vadd.f32 %v2283_v52, %v2282_v1 }
 0x419   : > { %v2129_v32 = vadd.f32 %v2128_v20, %v4395_v51  ;;  %vm2376_vm7 = vcmp.eq.f32.partialorder %v2375_v62, 8.507059e+37 }
 0x41a   : > { %v2187_v53 = vmax.f32 %v2156_v46, 0.0  ;;  %v2331_v0 = vadd.f32 %v2330_v18, %v2284_v43 }
 0x41b   : > { %v2190_v26 = vmax.f32 %v2129_v32, 0.0  ;;  %v2377_v32 = vand.u32 2147483648, %v2348_v50 }
 0x41c   : > { %v2267_v48 = vmul.f32 %v4413_v47, %v2187_v53  ;;  %v2752_v49 = vmul.f32 -1.442695, %v2331_v0 }
 0x41d   : > { %v2270_v33 = vmul.f32 %v4418_v4, %v2190_v26  ;;  %v2378_v41 = vor.u32 1.1754944e-38, %v2377_v32 }
 0x41e   : > { %v2316_v25 = vadd.f32 %v2315_v14, %v2267_v48  ;;  %2850 = vpow2.f32 %v2752_v49 }
 0x41f   : > { %v2157_v60 = vpop.f32.mrf.mxu3  ;;  %v2304_v23 = vadd.f32 %v2303_v63, %v2270_v33  ;;  %2852 = vrcp.f32 %v2348_v50 }
 0x420   : > { %v2158_v34 = vadd.f32 %v2157_v60, %v4395_v51 }
 0x421   : > { %v2305_v55 = vrot.slane %v2304_v23, 4 }
 0x422   : > { %v2191_v24 = vmax.f32 %v2158_v34, 0.0 }
 0x423   : > { %v2306_v16 = vadd.f32 %v2305_v55, %v2304_v23 }
 0x424   : > { %v2271_v10 = vmul.f32 %v4418_v4, %v2191_v24  ;;  %v2851_v9 = vpop.eup %2850 }
 0x425   : > { %v2307_v27 = vrot.slane %v2306_v16, 2  ;;  %v4461_v59 = vadd.f32 1.0, %v2851_v9  ;;  %v2853_v28 = vpop.eup %2852 }
 0x426   : > { %v2317_v58 = vadd.f32 %v2316_v25, %v2271_v10  ;;  %v2367_v44 = vmul.f32 %v2853_v28, %v2348_v50  ;;  %vm2372_vm1 = vweird.f32 %v2853_v28 }
 0x427   : > { %v2308_v22 = vadd.f32 %v2307_v27, %v2306_v16  ;;  %vm4471_vm5 = vmor %vm2371_vm2, %vm2372_vm1  ;;  %vm2356_vm10 = vweird.f32 %v4461_v59  ;;  %v2362_v48 = vand.u32 2147483648, %v4461_v59  ;;  %v2360_v14 = vand.u32 2147483647, %v4461_v59 }
 0x428   : > { %v2318_v21 = vrot.slane %v2317_v58, 4  ;;  %v2368_v5 = vsub.f32 1.0, %v2367_v44  ;;  %v2425_v16 = vlaneseq  ;;  %vm2420_vm1 = vcmask 1042434  }
 0x429   : > { %v2309_v47 = vrot.slane %v2308_v22, 1  ;;  %vm2361_vm2 = vcmp.eq.f32.partialorder %v2360_v14, 8.507059e+37 }
 0x42a   : > { %v2319_v36 = vadd.f32 %v2318_v21, %v2317_v58  ;;  %v2369_v46 = vmul.f32 %v2853_v28, %v2368_v5  ;;  %v2363_v58 = vor.u32 1.1754944e-38, %v2362_v48 }
 0x42b   : > { %v2310_v11 = vadd.f32 %v2309_v47, %v2308_v22 }
 0x42c   : > { %v2320_v51 = vrot.slane %v2319_v36, 2  ;;  %v2370_v29 = vadd.f32 %v2853_v28, %v2369_v46 }
 0x42d   : > { %v2333_v7 = vadd.f32 %v2330_v18, %v2310_v11 }
 0x42e   : > { %v2321_v8 = vadd.f32 %v2320_v51, %v2319_v36  ;;  %v2374_v53 = vsel %vm4471_vm5, %v2853_v28, %v2370_v29 }
 0x42f   : > { %v2754_v1 = vmul.f32 -1.442695, %v2333_v7  ;;  %v2379_v23 = vsel %vm2376_vm7, %v2378_v41, %v2374_v53 }
 0x430   : > { %v2322_v15 = vrot.slane %v2321_v8, 1  ;;  %v2415_v27 = vrot.slane %v2379_v23, 7 }
 0x431   : > { %2854 = vpow2.f32 %v2754_v1 }
 0x432   : > { %v2323_v4 = vadd.f32 %v2322_v15, %v2321_v8  ;;  %2856 = vrcp.f32 %v4461_v59 }
 0x434   : > { %v2334_v31 = vadd.f32 %v2330_v18, %v2323_v4 }
 0x436   : > { %v2755_v35 = vmul.f32 -1.442695, %v2334_v31 }
 0x437   : > { %v2855_v17 = vpop.eup %2854 }
 0x438   : > { %2858 = vpow2.f32 %v2755_v35  ;;  %v2349_v40 = vadd.f32 1.0, %v2855_v17  ;;  %v4464_v19 = vpop.eup %2856 }
 0x439   : > { %v2352_v3 = vmul.f32 %v4464_v19, %v4461_v59  ;;  %vm2357_vm4 = vweird.f32 %v4464_v19 }
 0x43a   : > { %2860 = vrcp.f32 %v2349_v40  ;;  %v2392_v54 = vand.u32 2147483648, %v2349_v40  ;;  %vm2386_vm6 = vweird.f32 %v2349_v40  ;;  %v2390_v26 = vand.u32 2147483647, %v2349_v40  ;;  %vm4493_vm11 = vmor %vm2356_vm10, %vm2357_vm4 }
 0x43b   : > { %v2353_v52 = vsub.f32 1.0, %v2352_v3  ;;  %vm2427_vm4 = vcmp.lt.s32.totalorder %v2425_v16, 512 }
 0x43c   : > { %v2393_v34 = vor.u32 1.1754944e-38, %v2392_v54  ;;  %vm2391_vm12 = vcmp.eq.f32.partialorder %v2390_v26, 8.507059e+37 }
 0x43d   : > { %v2354_v13 = vmul.f32 %v4464_v19, %v2353_v52 }
 0x43e   : > { %v2859_v38 = vpop.eup %2858 }
 0x43f   : > { %v2350_v6 = vadd.f32 1.0, %v2859_v38  ;;  %v2355_v39 = vadd.f32 %v4464_v19, %v2354_v13 }
 0x440   : > { %v2861_v57 = vpop.eup %2860 }
 0x441   : > { %2862 = vrcp.f32 %v2350_v6  ;;  %v2382_v18 = vmul.f32 %v2861_v57, %v2349_v40  ;;  %vm2387_vm3 = vweird.f32 %v2861_v57  ;;  %v2407_v33 = vand.u32 2147483648, %v2350_v6 }
 0x442   : > { %vm4482_vm8 = vmor %vm2386_vm6, %vm2387_vm3  ;;  %v2405_v37 = vand.u32 2147483647, %v2350_v6  ;;  %vm2401_vm13 = vweird.f32 %v2350_v6  ;;  %v2359_v10 = vsel %vm4493_vm11, %v4464_v19, %v2355_v39  ;;  %vm2422_vm3 = vcmask 1041408  }
 0x443   : > { %v2383_v2 = vsub.f32 1.0, %v2382_v18  ;;  %v2408_v25 = vor.u32 1.1754944e-38, %v2407_v33  ;;  %v2364_v47 = vsel %vm2361_vm2, %v2363_v58, %v2359_v10 }
 0x444   : > { %vm2406_vm15 = vcmp.eq.f32.partialorder %v2405_v37, 8.507059e+37  ;;  %v2419_v36 = vsel %vm2418_vm0, %v2364_v47, %v2415_v27 }
 0x445   : > { %v2384_v20 = vmul.f32 %v2861_v57, %v2383_v2 }
 0x447   : > { %v2863_v56 = vpop.eup %2862  ;;  %v2385_v45 = vadd.f32 %v2861_v57, %v2384_v20 }
 0x448   : > { %v2397_v42 = vmul.f32 %v2863_v56, %v2350_v6  ;;  %vm2402_vm9 = vweird.f32 %v2863_v56 }
 0x449   : > { %v2389_v12 = vsel %vm4482_vm8, %v2861_v57, %v2385_v45  ;;  %vm2403_vm14 = vmor %vm2401_vm13, %vm2402_vm9 }
 0x44a   : > { %v2398_v43 = vsub.f32 1.0, %v2397_v42  ;;  %v2394_v24 = vsel %vm2391_vm12, %v2393_v34, %v2389_v12 }
 0x44b   : > { %v2416_v21 = vrot.slane %v2394_v24, 6 }
 0x44c   : > { %v2399_v60 = vmul.f32 %v2863_v56, %v2398_v43 }
 0x44e   : > { %v2400_v55 = vadd.f32 %v2863_v56, %v2399_v60 }
 0x450   : > { %v2404_v49 = vsel %vm2403_vm14, %v2863_v56, %v2400_v55 }
 0x451   : > { %v2409_v22 = vsel %vm2406_vm15, %v2408_v25, %v2404_v49 }
 0x452   : > { %v2417_v30 = vrot.slane %v2409_v22, 5 }
 0x454   : > { %v2421_v11 = vsel %vm2420_vm1, %v2416_v21, %v2417_v30 }
 0x455   : > { %v2423_v51 = vsel %vm2422_vm3, %v2419_v36, %v2421_v11 }
 0x456   : > { %2429 = vst.msk [vmem:[%s327_s30] sm:$0xf] %vm2427_vm4, %v2423_v51 }
 0x457   : > { %2891 = shalt.err (!%p2888_p3)
}
 0x458   : > { %2805 = dma.vmem_to_hbm [thread:$0]  (%p3020_p5), %s2444_s10, 64, %s2446_s15, %s2431_s17  }
 0x459 PF: > { %p2811_p4 = scmp.ge.s32.totalorder %s2926_s14, 2  ;;  %s2457_s25 = sand.u32 1, %s2914_s11  }
 0x45a   : > { %s2458_s28 = scalar_lea.sflag [#allocation4], %s2457_s25 }
 0x45b   : > { %p2808_p7 = pnand %p2811_p4, %p3024_p6 }
 0x45d   : > { %p2809_p8 = pneg %p2808_p7 }
 0x45f   : > { %2909 = dma.done.wait (%p2809_p8), %s2458_s28, 64  }
 0x460   : > { %2911 = vsyncadd (%p2809_p8), %s2458_s28, 4294967232  ;;  %p21_p9 = scmp.ge.s32.totalorder %s3007_s16, 4   ;;  %s4698_s11 = smov %s2918_s12 }
 0x461   : > { %s4699_s12 = smov %s2922_s13  ;;  %s4700_s13 = smov %s3018_s19 }
 0x462   : > { %s4701_s14 = smov %s3007_s16  ;;  %23 = sbr.rel (!%p21_p9) target bundleno = 6 (0x6), region = 91 }
 0x467   :  { %2464 = vsyncpa [#allocation4], 1 }
 0x468   :  { %2466 = vsyncpa [#allocation4 + $0x1], 1 }

</bundles_post_ra>
